<compile_context>
chip_gen: v6e
topology: v6e:2x2x1
jax: 0.10.0
libtpu: 0.0.40
codegen_flags: <defaults>
</compile_context>

<pallas_src>
import numpy as np
import jax
import jax.numpy as jnp
from jax.experimental import pallas as pl
from jax.experimental.pallas import tpu as pltpu

LANE = 128


# ----------------------------- Pallas kernel ----------------------------------

def _maxblur_kernel(x_ref, o_ref):
    # x_ref: (H, W, GB, LANE)   o_ref: (Ho, Wo, GB, LANE)
    H, W, GB, L = x_ref.shape
    Ho, Wo = o_ref.shape[0], o_ref.shape[1]

    x = x_ref[...]                                        # native dtype; max is exact

    # MaxPool2d(kernel_size=2, stride=1, padding=0): (H, W) -> (H-1, W-1)
    xw = jnp.maximum(x[:, :-1], x[:, 1:])                 # (H,   W-1, GB, L)
    mp = jnp.maximum(xw[:-1], xw[1:]).astype(jnp.float32)  # (H-1, W-1, GB, L), f32 accum

    # ---- blur along W, slab-wise: [0.25, 0.5, 0.25], stride 2, zero pad 1 ----------
    zc = jnp.zeros((H - 1, 1, GB, L), jnp.float32)
    mp_p = jnp.concatenate([mp, zc], axis=1)              # (H-1, W, GB, L); col W-1 = pad 0
    mp_r = mp_p.reshape(H - 1, Wo, 2, GB, L)              # leading-dim split; minor dims untouched
    ev = mp_r[:, :, 0]                                    # centre W taps  (H-1, Wo, GB, L)
    od = mp_r[:, :, 1]                                    # right  W taps  (last col is the pad)
    od_m1 = jnp.concatenate([zc, od[:, :-1]], axis=1)     # left   W taps  (first col is pad 0)
    wblur = 0.5 * ev + 0.25 * (od + od_m1)                # (H-1, Wo, GB, L)

    # ---- blur along H, slab-wise: [0.25, 0.5, 0.25], stride 2, zero pad 1 ----------
    zr = jnp.zeros((1, Wo, GB, L), jnp.float32)
    wpad = jnp.concatenate([wblur, zr], axis=0)           # (H, Wo, GB, L); row H-1 = pad 0
    wr = wpad.reshape(Ho, 2, Wo, GB, L)
    cen = wr[:, 0]                                        # rows 0,2,...   (Ho, Wo, GB, L)
    dwn = wr[:, 1]                                        # rows 1,3,...   (last row is the pad)
    up = jnp.concatenate([zr, dwn[:-1]], axis=0)          # rows -1,1,...  (first row is pad 0)
    out = 0.5 * cen + 0.25 * (dwn + up)                   # (Ho, Wo, GB, L)

    o_ref[...] = out.astype(o_ref.dtype)


# ----------------------------- wrapper -----------------------------------------

def max_blur_pool2d(x, kernel_size=2, stride=2, padding=0, blur_kernel_size=3):
    """Pallas TPU implementation of MaxBlurPool2d.forward (module defaults,
    blur_position='after'): MaxPool2d(2, stride=1) then 3x3 binomial blur, stride 2, pad 1."""
    assert kernel_size == 2 and padding == 0, "specialized to module defaults"
    assert stride == 2 and blur_kernel_size == 3, "specialized to module defaults"
    B, C, H, W = x.shape
    assert H % 2 == 0 and W % 2 == 0, "even spatial dims expected"
    Ho, Wo = H // 2, W // 2
    N = B * C
    itemsize = jnp.dtype(x.dtype).itemsize

    # --- generation-aware VMEM budget ----------------------------------------------
    try:
        vmem_cap = int(pltpu.get_tpu_info().vmem_capacity_bytes)   # 64 MiB (v7x) / 128 MiB (v5e/v6e)
    except Exception:
        vmem_cap = 64 * 1024 * 1024                                # conservative (v7x-sized) default
    vmem_limit = min(vmem_cap * 3 // 4, 96 * 1024 * 1024)

    # live VMEM per 128-lane channel group: double-buffered in/out blocks plus the
    # f32 intermediates inside the kernel (xw, mp, wblur, temps)
    g_in = H * W * LANE * itemsize
    g_f32 = H * W * LANE * 4
    per_group = 4 * g_f32 + 4 * g_in

    align = 8 if itemsize >= 4 else 16          # second-to-last block dim must match tiling
    G = int(pl.cdiv(N, LANE))                   # number of 128-lane channel groups
    gb_fit = max(1, vmem_limit // per_group)

    if G <= align:
        # tiny channel count: block spans the full (padded) group axis (legal: equals
        # the full array dim), grid may collapse to 1 step.
        GB = G
    else:
        target_steps = 4 if G >= 4 * align else 2   # keep >=2 (ideally >=4) grid steps
        GB = min(int(gb_fit), int(pl.cdiv(G, target_steps)))
        GB = max(align, (GB // align) * align)
    G_pad = int(pl.cdiv(G, GB)) * GB
    N_pad = G_pad * LANE

    # ensure the scoped limit covers the chosen block (+headroom), never past physical
    vmem_limit = int(min(max(vmem_limit, per_group * GB + (4 << 20)),
                         vmem_cap - (4 << 20)))

    # --- layout plumbing: NCHW -> (H, W, G_pad, 128), channels on lanes -------------
    xf = x.reshape(N, H, W)
    if N_pad != N:
        xf = jnp.pad(xf, ((0, N_pad - N), (0, 0), (0, 0)))
    xt = jnp.transpose(xf, (1, 2, 0)).reshape(H, W, G_pad, LANE)

    out = pl.pallas_call(
        _maxblur_kernel,
        out_shape=jax.ShapeDtypeStruct((Ho, Wo, G_pad, LANE), x.dtype),
        grid_spec=pltpu.PrefetchScalarGridSpec(
            num_scalar_prefetch=0,
            grid=(G_pad // GB,),
            in_specs=[pl.BlockSpec((H, W, GB, LANE), lambda g: (0, 0, g, 0))],
            out_specs=pl.BlockSpec((Ho, Wo, GB, LANE), lambda g: (0, 0, g, 0)),
        ),
        compiler_params=pltpu.CompilerParams(
            dimension_semantics=("parallel",),
            vmem_limit_bytes=vmem_limit,
        ),
        cost_estimate=pl.CostEstimate(
            flops=int(N_pad * (3 * H * W + 8 * Ho * Wo)),
            transcendentals=0,
            bytes_accessed=int(N_pad * (H * W + Ho * Wo) * itemsize),
        ),
    )(xt)

    # --- undo layout plumbing --------------------------------------------------------
    out = out.reshape(Ho, Wo, N_pad)[:, :, :N]
    return jnp.transpose(out, (2, 0, 1)).reshape(B, C, Ho, Wo)


# ----------------------------- reference (pure XLA, for checking) ---------------

def _reference(x, blur_kernel_size=3, stride=2):
    mp = jax.lax.reduce_window(x, -jnp.inf, jax.lax.max,
                               (1, 1, 2, 2), (1, 1, 1, 1), 'VALID')
    v = np.array([1.0, 2.0, 1.0], dtype=np.float32)
    v = v / v.sum()
    k2d = jnp.asarray(np.outer(v, v), dtype=jnp.float32).reshape(1, 1, 3, 3)
    B, C, Hm, Wm = mp.shape
    p = (blur_kernel_size - 1) // 2
    y = jax.lax.conv_general_dilated(
        mp.reshape(B * C, 1, Hm, Wm), k2d,
        window_strides=(stride, stride), padding=((p, p), (p, p)),
        dimension_numbers=('NCHW', 'OIHW', 'NCHW'))
    return y.reshape(B, C, y.shape[2], y.shape[3])


if __name__ == "__main__":
    key = jax.random.PRNGKey(0)
    x = jax.random.normal(key, (2, 4, 16, 16), dtype=jnp.float32)

    y = jax.block_until_ready(max_blur_pool2d(x))          # (2, 4, 8, 8)
    y_ref = jax.block_until_ready(_reference(x))

    assert y.shape == (2, 4, 8, 8), y.shape
    np.testing.assert_allclose(np.asarray(y), np.asarray(y_ref), rtol=1e-5, atol=1e-5)

    print("KERNEL_OK")
</pallas_src>

<mosaic_0001>
module attributes {stable_mosaic.version = 11 : i64} {
  func.func @_maxblur_kernel(%arg0: i32, %arg1: memref<16x16x1x128xf32, #tpu.memory_space<vmem>>, %arg2: memref<8x8x1x128xf32, #tpu.memory_space<vmem>>) attributes {dimension_semantics = [#tpu.dimension_semantics<parallel>], iteration_bounds = array<i64: 1>, scalar_prefetch = 0 : i64, scratch_operands = 0 : i64, tpu.core_type = #tpu.core_type<tc>, window_params = [{transform_indices = @transform_0, window_bounds = array<i64: 16, 16, 1, 128>}, {transform_indices = @transform_1, window_bounds = array<i64: 8, 8, 1, 128>}]} {
    %c0 = arith.constant 0 : index
    %c0_0 = arith.constant 0 : index
    %c0_1 = arith.constant 0 : index
    %c0_2 = arith.constant 0 : index
    %0 = vector.load %arg1[%c0, %c0_0, %c0_1, %c0_2] : memref<16x16x1x128xf32, #tpu.memory_space<vmem>>, vector<16x16x1x128xf32>
    %1 = vector.extract_strided_slice %0 {offsets = [0, 0, 0, 0], sizes = [16, 15, 1, 128], strides = [1, 1, 1, 1]} : vector<16x16x1x128xf32> to vector<16x15x1x128xf32>
    %2 = vector.extract_strided_slice %0 {offsets = [0, 1, 0, 0], sizes = [16, 15, 1, 128], strides = [1, 1, 1, 1]} : vector<16x16x1x128xf32> to vector<16x15x1x128xf32>
    %3 = arith.maximumf %1, %2 : vector<16x15x1x128xf32>
    %4 = vector.extract_strided_slice %3 {offsets = [0, 0, 0, 0], sizes = [15, 15, 1, 128], strides = [1, 1, 1, 1]} : vector<16x15x1x128xf32> to vector<15x15x1x128xf32>
    %5 = vector.extract_strided_slice %3 {offsets = [1, 0, 0, 0], sizes = [15, 15, 1, 128], strides = [1, 1, 1, 1]} : vector<16x15x1x128xf32> to vector<15x15x1x128xf32>
    %6 = arith.maximumf %4, %5 : vector<15x15x1x128xf32>
    %cst = arith.constant 0.000000e+00 : f32
    %7 = vector.broadcast %cst : f32 to vector<15x1x1x128xf32>
    %8 = tpu.concatenate %6, %7 in 1 : vector<15x15x1x128xf32>, vector<15x1x1x128xf32> -> vector<15x16x1x128xf32>
    %9 = vector.shape_cast %8 : vector<15x16x1x128xf32> to vector<15x8x2x1x128xf32>
    %10 = vector.extract_strided_slice %9 {offsets = [0, 0, 0, 0, 0], sizes = [15, 8, 1, 1, 128], strides = [1, 1, 1, 1, 1]} : vector<15x8x2x1x128xf32> to vector<15x8x1x1x128xf32>
    %11 = vector.shape_cast %10 : vector<15x8x1x1x128xf32> to vector<15x8x1x128xf32>
    %12 = vector.extract_strided_slice %9 {offsets = [0, 0, 1, 0, 0], sizes = [15, 8, 1, 1, 128], strides = [1, 1, 1, 1, 1]} : vector<15x8x2x1x128xf32> to vector<15x8x1x1x128xf32>
    %13 = vector.shape_cast %12 : vector<15x8x1x1x128xf32> to vector<15x8x1x128xf32>
    %14 = vector.extract_strided_slice %13 {offsets = [0, 0, 0, 0], sizes = [15, 7, 1, 128], strides = [1, 1, 1, 1]} : vector<15x8x1x128xf32> to vector<15x7x1x128xf32>
    %15 = tpu.concatenate %7, %14 in 1 : vector<15x1x1x128xf32>, vector<15x7x1x128xf32> -> vector<15x8x1x128xf32>
    %cst_3 = arith.constant 5.000000e-01 : f32
    %16 = vector.broadcast %cst_3 : f32 to vector<15x8x1x128xf32>
    %17 = arith.mulf %16, %11 : vector<15x8x1x128xf32>
    %18 = arith.addf %13, %15 : vector<15x8x1x128xf32>
    %cst_4 = arith.constant 2.500000e-01 : f32
    %19 = vector.broadcast %cst_4 : f32 to vector<15x8x1x128xf32>
    %20 = arith.mulf %19, %18 : vector<15x8x1x128xf32>
    %21 = arith.addf %17, %20 : vector<15x8x1x128xf32>
    %cst_5 = arith.constant 0.000000e+00 : f32
    %22 = vector.broadcast %cst_5 : f32 to vector<1x8x1x128xf32>
    %23 = tpu.concatenate %21, %22 in 0 : vector<15x8x1x128xf32>, vector<1x8x1x128xf32> -> vector<16x8x1x128xf32>
    %24 = vector.shape_cast %23 : vector<16x8x1x128xf32> to vector<8x2x8x1x128xf32>
    %25 = vector.extract_strided_slice %24 {offsets = [0, 0, 0, 0, 0], sizes = [8, 1, 8, 1, 128], strides = [1, 1, 1, 1, 1]} : vector<8x2x8x1x128xf32> to vector<8x1x8x1x128xf32>
    %26 = vector.shape_cast %25 : vector<8x1x8x1x128xf32> to vector<8x8x1x128xf32>
    %27 = vector.extract_strided_slice %24 {offsets = [0, 1, 0, 0, 0], sizes = [8, 1, 8, 1, 128], strides = [1, 1, 1, 1, 1]} : vector<8x2x8x1x128xf32> to vector<8x1x8x1x128xf32>
    %28 = vector.shape_cast %27 : vector<8x1x8x1x128xf32> to vector<8x8x1x128xf32>
    %29 = vector.extract_strided_slice %28 {offsets = [0, 0, 0, 0], sizes = [7, 8, 1, 128], strides = [1, 1, 1, 1]} : vector<8x8x1x128xf32> to vector<7x8x1x128xf32>
    %30 = tpu.concatenate %22, %29 in 0 : vector<1x8x1x128xf32>, vector<7x8x1x128xf32> -> vector<8x8x1x128xf32>
    %cst_6 = arith.constant 5.000000e-01 : f32
    %31 = vector.broadcast %cst_6 : f32 to vector<8x8x1x128xf32>
    %32 = arith.mulf %31, %26 : vector<8x8x1x128xf32>
    %33 = arith.addf %28, %30 : vector<8x8x1x128xf32>
    %cst_7 = arith.constant 2.500000e-01 : f32
    %34 = vector.broadcast %cst_7 : f32 to vector<8x8x1x128xf32>
    %35 = arith.mulf %34, %33 : vector<8x8x1x128xf32>
    %36 = arith.addf %32, %35 : vector<8x8x1x128xf32>
    %c0_8 = arith.constant 0 : index
    %c0_9 = arith.constant 0 : index
    %c0_10 = arith.constant 0 : index
    %c0_11 = arith.constant 0 : index
    %37 = vector.load %arg2[%c0_8, %c0_9, %c0_10, %c0_11] : memref<8x8x1x128xf32, #tpu.memory_space<vmem>>, vector<8x8x1x128xf32>
    tpu.vector_store %arg2[%c0_8, %c0_9, %c0_10, %c0_11], %36 {strides = array<i32>} : memref<8x8x1x128xf32, #tpu.memory_space<vmem>>, vector<8x8x1x128xf32>,
    return
  }
  func.func @transform_0(%arg0: i32) -> (i32, i32, i32, i32) {
    %c0_i32 = arith.constant 0 : i32
    %c0_i32_0 = arith.constant 0 : i32
    %c0_i32_1 = arith.constant 0 : i32
    %c0_i32_2 = arith.constant 0 : i32
    return %c0_i32, %c0_i32_0, %arg0, %c0_i32_1 : i32, i32, i32, i32
  }
  func.func @transform_1(%arg0: i32) -> (i32, i32, i32, i32) {
    %c0_i32 = arith.constant 0 : i32
    %c0_i32_0 = arith.constant 0 : i32
    %c0_i32_1 = arith.constant 0 : i32
    %c0_i32_2 = arith.constant 0 : i32
    return %c0_i32, %c0_i32_0, %arg0, %c0_i32_1 : i32, i32, i32, i32
  }
}

</mosaic_0001>

<bundles_post_ra>
// kernel: tpu_custom_call.1
= control target key start
LH: loop header
LB: loop body
LE: loop exit
PB: predicated region body
PF: predicated region fallthrough
CT: control target
= control target key end

     0   :  { %6 = vsyncpa [#allocation3], 0  ;;  %s2279_s0 = inlined_call_operand.hbm [shape: f32[16,16,1,128], index: 0, kind: input, shape index: {}]   ;;  %s2280_s1 = inlined_call_operand.hbm [shape: f32[8,8,1,128], index: 1, kind: output, shape index: {}]  }
   0x1   :  { %7 = vsyncpa [#allocation4], 0  ;;  %s1609_s6 = smov [#allocation2]  }
   0x2   :  { %s13_s7 = sshll.u32 %s1609_s6, 4  ;;  %s14_s7 = int_to_ptr.vmem [resolvable:$true] %s13_s7 }
   0x3   :  { %s1573_s8 = scalar_lea.vmem %s14_s7, 4096  ;;  %p1578_p1 = scmp.lt.s32.totalorder %s14_s7, %s14_s7 }
   0x4   :  { %p1574_p0 = scmp.ne.s32.totalorder %s14_s7, %s1573_s8  ;;  %p1579_p2 = scmp.lt.s32.totalorder %s1573_s8, %s1573_s8 }
   0x6   :  { %p1580_p3 = por %p1579_p2, %p1578_p1 }
   0x8   :  { %p1581_p4 = pnand %p1580_p3, %p1574_p0 }
   0xa   :  { %1584 = shalt.err (!%p1581_p4)
}
   0xb   :  { %s1610_s9 = smov 16   ;;  %s1611_s10 = smov 1  }
   0xc   :  { %19 = dma.hbm_to_vmem [thread:$0]  %s2279_s0, 4096, %s14_s7, [#allocation3], %s1610_s9, %s1610_s9, %s1611_s10  }
   0xd   :  { %1605 = dma.done.wait [#allocation3], 4096  }
   0xe   :  { %1606 = vsyncadd [#allocation3], 4294963200  ;;  %v23_v0 = vld [vmem:[#allocation2] sm:$0x1]  ;;  %v24_v1 = vld [vmem:[#allocation2 + $0x1] sm:$0x1] }
   0xf   :  { %v25_v2 = vld [vmem:[#allocation2 + $0x2] sm:$0x1]  ;;  %v39_v3 = vld [vmem:[#allocation2 + $0x10] sm:$0x1]  ;;  %v40_v4 = vld [vmem:[#allocation2 + $0x11] sm:$0x1]  ;;  %v279_v6 = vmax.f32 %v23_v0, %v24_v1 }
  0x10   :  { %v41_v5 = vld [vmem:[#allocation2 + $0x12] sm:$0x1]  ;;  %v280_v7 = vmax.f32 %v24_v1, %v25_v2  ;;  %v55_v8 = vld [vmem:[#allocation2 + $0x20] sm:$0x1]  ;;  %v56_v9 = vld [vmem:[#allocation2 + $0x21] sm:$0x1]  ;;  %v294_v11 = vmax.f32 %v39_v3, %v40_v4 }
  0x11   :  { %v57_v10 = vld [vmem:[#allocation2 + $0x22] sm:$0x1]  ;;  %v295_v12 = vmax.f32 %v40_v4, %v41_v5  ;;  %v1629_v13 = vmax.f32 %v55_v8, %v56_v9  ;;  %v26_v15 = vld [vmem:[#allocation2 + $0x3] sm:$0x1]  ;;  %v27_v16 = vld [vmem:[#allocation2 + $0x4] sm:$0x1] }
  0x12   :  { %v1631_v14 = vmax.f32 %v56_v9, %v57_v10  ;;  %v42_v17 = vld [vmem:[#allocation2 + $0x13] sm:$0x1]  ;;  %v519_v18 = vmax.f32 %v279_v6, %v294_v11  ;;  %v43_v20 = vld [vmem:[#allocation2 + $0x14] sm:$0x1]  ;;  %v58_v21 = vld [vmem:[#allocation2 + $0x23] sm:$0x1]  ;;  %v281_v23 = vmax.f32 %v25_v2, %v26_v15  ;;  %v282_v24 = vmax.f32 %v26_v15, %v27_v16 }
  0x13   :  { %v520_v19 = vmax.f32 %v280_v7, %v295_v12  ;;  %v59_v22 = vld [vmem:[#allocation2 + $0x24] sm:$0x1]  ;;  %v534_v25 = vmax.f32 %v294_v11, %v1629_v13  ;;  %v296_v27 = vmax.f32 %v41_v5, %v42_v17  ;;  %v297_v28 = vmax.f32 %v42_v17, %v43_v20  ;;  %v28_v33 = vld [vmem:[#allocation2 + $0x5] sm:$0x1]  ;;  %v29_v34 = vld [vmem:[#allocation2 + $0x6] sm:$0x1] }
  0x14   :  { %v535_v26 = vmax.f32 %v295_v12, %v1631_v14  ;;  %v744_v29 = vmul.f32 0.5, %v519_v18  ;;  %v1635_v31 = vmax.f32 %v57_v10, %v58_v21  ;;  %v1637_v32 = vmax.f32 %v58_v21, %v59_v22  ;;  %v44_v42 = vld [vmem:[#allocation2 + $0x15] sm:$0x1]  ;;  %v45_v43 = vld [vmem:[#allocation2 + $0x16] sm:$0x1]  ;;  %s1612_s0 = smov [#allocation5]  }
  0x15   :  { %v984_v30 = vmul.f32 0.25, %v520_v19  ;;  %v752_v35 = vmul.f32 0.5, %v534_v25  ;;  %v521_v37 = vmax.f32 %v281_v23, %v296_v27  ;;  %v522_v38 = vmax.f32 %v282_v24, %v297_v28  ;;  %v60_v48 = vld [vmem:[#allocation2 + $0x25] sm:$0x1]  ;;  %v61_v49 = vld [vmem:[#allocation2 + $0x26] sm:$0x1] }
  0x16   :  { %v992_v36 = vmul.f32 0.25, %v535_v26  ;;  %v536_v40 = vmax.f32 %v296_v27, %v1635_v31  ;;  %v537_v41 = vmax.f32 %v297_v28, %v1637_v32  ;;  %v283_v44 = vmax.f32 %v27_v16, %v28_v33  ;;  %v30_v59 = vld [vmem:[#allocation2 + $0x7] sm:$0x1]  ;;  %v31_v60 = vld [vmem:[#allocation2 + $0x8] sm:$0x1]  ;;  %s1549_s13 = sshll.u32 %s1612_s0, 4  ;;  %s1550_s13 = int_to_ptr.vmem [resolvable:$true] %s1549_s13 }
  0x17   :  { %v1104_v39 = vadd.f32 %v984_v30, %v744_v29  ;;  %v745_v46 = vmul.f32 0.5, %v521_v37  ;;  %v865_v47 = vadd.f32 %v522_v38, %v520_v19  ;;  %v284_v50 = vmax.f32 %v28_v33, %v29_v34  ;;  %v46_v5 = vld [vmem:[#allocation2 + $0x17] sm:$0x1]  ;;  %v47_v6 = vld [vmem:[#allocation2 + $0x18] sm:$0x1]  ;;  %s1585_s14 = scalar_lea.vmem %s1550_s13, 1024  ;;  %p1590_p6 = scmp.lt.s32.totalorder %s1550_s13, %s1550_s13 }
  0x18   :  { %v1641_v45 = vadd.f32 %v992_v36, %v752_v35  ;;  %v753_v52 = vmul.f32 0.5, %v536_v40  ;;  %v873_v53 = vadd.f32 %v537_v41, %v535_v26  ;;  %v298_v54 = vmax.f32 %v43_v20, %v44_v42  ;;  %v62_v10 = vld [vmem:[#allocation2 + $0x27] sm:$0x1]  ;;  %v63_v11 = vld [vmem:[#allocation2 + $0x28] sm:$0x1]  ;;  %p1586_p5 = scmp.ne.s32.totalorder %s1550_s13, %s1585_s14  ;;  %p1591_p7 = scmp.lt.s32.totalorder %s1585_s14, %s1585_s14 }
  0x19   :  { %v1224_v51 = vmul.f32 0.5, %v1104_v39  ;;  %v985_v56 = vmul.f32 0.25, %v865_v47  ;;  %v299_v57 = vmax.f32 %v44_v42, %v45_v43  ;;  %v1644_v58 = vmax.f32 %v59_v22, %v60_v48  ;;  %v32_v23 = vld [vmem:[#allocation2 + $0x9] sm:$0x1]  ;;  %v33_v24 = vld [vmem:[#allocation2 + $0xa] sm:$0x1] }
  0x1a   :  { %v1352_v55 = vmul.f32 0.25, %v1641_v45  ;;  %v993_v61 = vmul.f32 0.25, %v873_v53  ;;  %v1646_v62 = vmax.f32 %v60_v48, %v61_v49  ;;  %v523_v63 = vmax.f32 %v283_v44, %v298_v54  ;;  %v48_v35 = vld [vmem:[#allocation2 + $0x19] sm:$0x1]  ;;  %v49_v36 = vld [vmem:[#allocation2 + $0x1a] sm:$0x1]  ;;  %p1592_p8 = por %p1591_p7, %p1590_p6 }
  0x1b   :  { %v285_v0 = vmax.f32 %v29_v34, %v30_v59  ;;  %v1105_v2 = vadd.f32 %v985_v56, %v745_v46  ;;  %v524_v3 = vmax.f32 %v284_v50, %v299_v57  ;;  %v538_v4 = vmax.f32 %v298_v54, %v1644_v58  ;;  %v64_v40 = vld [vmem:[#allocation2 + $0x29] sm:$0x1]  ;;  %v34_v56 = vld [vmem:[#allocation2 + $0xb] sm:$0x1] }
  0x1c   :  { %v1416_v1 = vadd.f32 %v1352_v55, %v1224_v51  ;;  %v1649_v7 = vadd.f32 %v993_v61, %v753_v52  ;;  %v539_v8 = vmax.f32 %v299_v57, %v1646_v62  ;;  %v746_v9 = vmul.f32 0.5, %v523_v63  ;;  %v35_v57 = vld [vmem:[#allocation2 + $0xc] sm:$0x1]  ;;  %v50_v63 = vld [vmem:[#allocation2 + $0x1b] sm:$0x1]  ;;  %p1593_p9 = pnand %p1592_p8, %p1586_p5 }
  0x1d   :  { %v286_v12 = vmax.f32 %v30_v59, %v31_v60  ;;  %v1225_v15 = vmul.f32 0.5, %v1105_v2  ;;  %v754_v16 = vmul.f32 0.5, %v538_v4  ;;  %v866_v17 = vadd.f32 %v524_v3, %v522_v38 }
  0x1e   :  { %1480 = vst [vmem:[#allocation5] sm:$0x1] %v1416_v1  ;;  %v300_v18 = vmax.f32 %v45_v43, %v46_v5  ;;  %v1353_v19 = vmul.f32 0.25, %v1649_v7  ;;  %v874_v20 = vadd.f32 %v539_v8, %v537_v41  ;;  %v301_v21 = vmax.f32 %v46_v5, %v47_v6  ;;  %v65_v41 = vld [vmem:[#allocation2 + $0x2a] sm:$0x1] }
  0x1f   :  { %v1653_v22 = vmax.f32 %v61_v49, %v62_v10  ;;  %v986_v25 = vmul.f32 0.25, %v866_v17  ;;  %v1655_v26 = vmax.f32 %v62_v10, %v63_v11  ;;  %v287_v28 = vmax.f32 %v31_v60, %v32_v23 }
  0x20   :  { %v525_v27 = vmax.f32 %v285_v0, %v300_v18  ;;  %v1417_v29 = vadd.f32 %v1353_v19, %v1225_v15  ;;  %v994_v30 = vmul.f32 0.25, %v874_v20  ;;  %v526_v33 = vmax.f32 %v286_v12, %v301_v21  ;;  %v51_v0 = vld [vmem:[#allocation2 + $0x1c] sm:$0x1] }
  0x21   :  { %v540_v34 = vmax.f32 %v300_v18, %v1653_v22  ;;  %v1106_v37 = vadd.f32 %v986_v25, %v746_v9  ;;  %v541_v38 = vmax.f32 %v301_v21, %v1655_v26  ;;  %v288_v42 = vmax.f32 %v32_v23, %v33_v24  ;;  %v37_v25 = vld [vmem:[#allocation2 + $0xe] sm:$0x1] }
  0x22   :  { %v747_v39 = vmul.f32 0.5, %v525_v27  ;;  %1481 = vst [vmem:[#allocation5 + $0x1] sm:$0x1] %v1417_v29  ;;  %v1659_v43 = vadd.f32 %v994_v30, %v754_v16  ;;  %v867_v46 = vadd.f32 %v526_v33, %v524_v3  ;;  %v302_v47 = vmax.f32 %v47_v6, %v48_v35  ;;  %v66_v6 = vld [vmem:[#allocation2 + $0x2b] sm:$0x1] }
  0x23   :  { %v755_v44 = vmul.f32 0.5, %v540_v34  ;;  %v1226_v48 = vmul.f32 0.5, %v1106_v37  ;;  %v875_v49 = vadd.f32 %v541_v38, %v539_v8  ;;  %v303_v50 = vmax.f32 %v48_v35, %v49_v36  ;;  %v67_v8 = vld [vmem:[#allocation2 + $0x2c] sm:$0x1]  ;;  %v52_v37 = vld [vmem:[#allocation2 + $0x1d] sm:$0x1] }
  0x24   :  { %v1661_v51 = vmax.f32 %v63_v11, %v64_v40  ;;  %v1354_v52 = vmul.f32 0.25, %v1659_v43  ;;  %v987_v53 = vmul.f32 0.25, %v867_v46  ;;  %v1664_v54 = vmax.f32 %v64_v40, %v65_v41 }
  0x25   :  { %v527_v55 = vmax.f32 %v287_v28, %v302_v47  ;;  %v995_v59 = vmul.f32 0.25, %v875_v49  ;;  %v528_v60 = vmax.f32 %v288_v42, %v303_v50  ;;  %v289_v1 = vmax.f32 %v33_v24, %v34_v56  ;;  %v36_v24 = vld [vmem:[#allocation2 + $0xd] sm:$0x1] }
  0x26   :  { %v542_v61 = vmax.f32 %v302_v47, %v1661_v51  ;;  %v1418_v2 = vadd.f32 %v1354_v52, %v1226_v48  ;;  %v1107_v3 = vadd.f32 %v987_v53, %v747_v39  ;;  %v543_v4 = vmax.f32 %v303_v50, %v1664_v54  ;;  %v68_v39 = vld [vmem:[#allocation2 + $0x2d] sm:$0x1]  ;;  %v38_v47 = vld [vmem:[#allocation2 + $0xf] sm:$0x1] }
  0x27   :  { %v748_v5 = vmul.f32 0.5, %v527_v55  ;;  %v1668_v9 = vadd.f32 %v995_v59, %v755_v44  ;;  %v868_v11 = vadd.f32 %v528_v60, %v526_v33  ;;  %v290_v12 = vmax.f32 %v34_v56, %v35_v57  ;;  %v69_v44 = vld [vmem:[#allocation2 + $0x2e] sm:$0x1]  ;;  %v54_v59 = vld [vmem:[#allocation2 + $0x1f] sm:$0x1] }
  0x28   :  { %v756_v10 = vmul.f32 0.5, %v542_v61  ;;  %1482 = vst [vmem:[#allocation5 + $0x2] sm:$0x1] %v1418_v2  ;;  %v1227_v15 = vmul.f32 0.5, %v1107_v3  ;;  %v876_v16 = vadd.f32 %v543_v4, %v541_v38  ;;  %v304_v17 = vmax.f32 %v49_v36, %v50_v63  ;;  %v53_v38 = vld [vmem:[#allocation2 + $0x1e] sm:$0x1] }
  0x29   :  { %v305_v18 = vmax.f32 %v50_v63, %v51_v0  ;;  %v1355_v19 = vmul.f32 0.25, %v1668_v9  ;;  %v988_v20 = vmul.f32 0.25, %v868_v11  ;;  %v1671_v21 = vmax.f32 %v65_v41, %v66_v6 }
  0x2a   :  { %v1673_v23 = vmax.f32 %v66_v6, %v67_v8  ;;  %v996_v27 = vmul.f32 0.25, %v876_v16  ;;  %v529_v28 = vmax.f32 %v289_v1, %v304_v17  ;;  %v291_v30 = vmax.f32 %v35_v57, %v36_v24 }
  0x2b   :  { %v530_v29 = vmax.f32 %v290_v12, %v305_v18  ;;  %v1419_v33 = vadd.f32 %v1355_v19, %v1227_v15  ;;  %v1108_v34 = vadd.f32 %v988_v20, %v748_v5  ;;  %v544_v35 = vmax.f32 %v304_v17, %v1671_v21  ;;  %v72_v15 = vld [vmem:[#allocation2 + $0x31] sm:$0x1]  ;;  %v73_v20 = vld [vmem:[#allocation2 + $0x32] sm:$0x1] }
  0x2c   :  { %v545_v36 = vmax.f32 %v305_v18, %v1673_v23  ;;  %v1677_v40 = vadd.f32 %v996_v27, %v756_v10  ;;  %v749_v41 = vmul.f32 0.5, %v529_v28  ;;  %v292_v46 = vmax.f32 %v36_v24, %v37_v25  ;;  %v87_v24 = vld [vmem:[#allocation2 + $0x40] sm:$0x1] }
  0x2d   :  { %v869_v42 = vadd.f32 %v530_v29, %v528_v60  ;;  %1483 = vst [vmem:[#allocation5 + $0x3] sm:$0x1] %v1419_v33  ;;  %v1228_v48 = vmul.f32 0.5, %v1108_v34  ;;  %v757_v49 = vmul.f32 0.5, %v544_v35  ;;  %v306_v52 = vmax.f32 %v51_v0, %v52_v37  ;;  %v70_v60 = vld [vmem:[#allocation2 + $0x2f] sm:$0x1] }
  0x2e   :  { %v877_v50 = vadd.f32 %v545_v36, %v543_v4  ;;  %v1356_v53 = vmul.f32 0.25, %v1677_v40  ;;  %v307_v56 = vmax.f32 %v52_v37, %v53_v38  ;;  %v1680_v57 = vmax.f32 %v67_v8, %v68_v39  ;;  %v71_v8 = vld [vmem:[#allocation2 + $0x30] sm:$0x1]  ;;  %v88_v33 = vld [vmem:[#allocation2 + $0x41] sm:$0x1] }
  0x2f   :  { %v989_v55 = vmul.f32 0.25, %v869_v42  ;;  %v1682_v63 = vmax.f32 %v68_v39, %v69_v44  ;;  %v531_v1 = vmax.f32 %v291_v30, %v306_v52  ;;  %v293_v2 = vmax.f32 %v37_v25, %v38_v47  ;;  %v89_v34 = vld [vmem:[#allocation2 + $0x42] sm:$0x1] }
  0x30   :  { %v997_v61 = vmul.f32 0.25, %v877_v50  ;;  %v1420_v3 = vadd.f32 %v1356_v53, %v1228_v48  ;;  %v532_v6 = vmax.f32 %v292_v46, %v307_v56  ;;  %v546_v10 = vmax.f32 %v306_v52, %v1680_v57 }
  0x31   :  { %v1109_v5 = vadd.f32 %v989_v55, %v749_v41  ;;  %v547_v0 = vmax.f32 %v307_v56, %v1682_v63  ;;  %v750_v11 = vmul.f32 0.5, %v531_v1  ;;  %v308_v12 = vmax.f32 %v53_v38, %v54_v59  ;;  %v74_v55 = vld [vmem:[#allocation2 + $0x33] sm:$0x1] }
  0x32   :  { %v1685_v4 = vadd.f32 %v997_v61, %v757_v49  ;;  %1484 = vst [vmem:[#allocation5 + $0x4] sm:$0x1] %v1420_v3  ;;  %v758_v17 = vmul.f32 0.5, %v546_v10  ;;  %v870_v18 = vadd.f32 %v532_v6, %v530_v29  ;;  %v1688_v19 = vmax.f32 %v69_v44, %v70_v60  ;;  %v75_v60 = vld [vmem:[#allocation2 + $0x34] sm:$0x1] }
  0x33   :  { %v1229_v16 = vmul.f32 0.5, %v1109_v5  ;;  %v878_v27 = vadd.f32 %v547_v0, %v545_v36  ;;  %v533_v28 = vmax.f32 %v293_v2, %v308_v12  ;;  %v991_v30 = vmul.f32 0.25, %v532_v6  ;;  %v90_v2 = vld [vmem:[#allocation2 + $0x43] sm:$0x1] }
  0x34   :  { %v1357_v25 = vmul.f32 0.25, %v1685_v4  ;;  %v990_v35 = vmul.f32 0.25, %v870_v18  ;;  %v548_v37 = vmax.f32 %v308_v12, %v1688_v19  ;;  %v999_v38 = vmul.f32 0.25, %v547_v0  ;;  %v91_v0 = vld [vmem:[#allocation2 + $0x44] sm:$0x1] }
  0x35   :  { %v324_v39 = vmax.f32 %v71_v8, %v72_v15  ;;  %v998_v42 = vmul.f32 0.25, %v878_v27  ;;  %v751_v46 = vmul.f32 0.5, %v533_v28  ;;  %v325_v29 = vmax.f32 %v72_v15, %v73_v20  ;;  %v76_v18 = vld [vmem:[#allocation2 + $0x35] sm:$0x1] }
  0x36   :  { %v1421_v41 = vadd.f32 %v1357_v25, %v1229_v16  ;;  %v1110_v44 = vadd.f32 %v990_v35, %v750_v11  ;;  %v759_v47 = vmul.f32 0.5, %v548_v37  ;;  %v1692_v48 = vmax.f32 %v87_v24, %v88_v33  ;;  %v77_v24 = vld [vmem:[#allocation2 + $0x36] sm:$0x1]  ;;  %v93_v35 = vld [vmem:[#allocation2 + $0x46] sm:$0x1] }
  0x37   :  { %v1694_v49 = vmax.f32 %v88_v33, %v89_v34  ;;  %v1696_v36 = vadd.f32 %v998_v42, %v758_v17  ;;  %v1111_v50 = vadd.f32 %v991_v30, %v751_v46  ;;  %v549_v52 = vmax.f32 %v1629_v13, %v324_v39  ;;  %v92_v33 = vld [vmem:[#allocation2 + $0x45] sm:$0x1] }
  0x38   :  { %1485 = vst [vmem:[#allocation5 + $0x5] sm:$0x1] %v1421_v41  ;;  %v550_v53 = vmax.f32 %v1631_v14, %v325_v29  ;;  %v1230_v56 = vmul.f32 0.5, %v1110_v44  ;;  %v1700_v59 = vadd.f32 %v999_v38, %v759_v47  ;;  %v564_v61 = vmax.f32 %v324_v39, %v1692_v48 }
  0x39   :  { %v565_v1 = vmax.f32 %v325_v29, %v1694_v49  ;;  %v1358_v3 = vmul.f32 0.25, %v1696_v36  ;;  %v1231_v5 = vmul.f32 0.5, %v1111_v50  ;;  %v760_v6 = vmul.f32 0.5, %v549_v52 }
  0x3a   :  { %v1000_v10 = vmul.f32 0.25, %v550_v53  ;;  %v1359_v13 = vmul.f32 0.25, %v1700_v59  ;;  %v768_v11 = vmul.f32 0.5, %v564_v61  ;;  %v326_v12 = vmax.f32 %v73_v20, %v74_v55  ;;  %v79_v61 = vld [vmem:[#allocation2 + $0x38] sm:$0x1] }
  0x3b   :  { %v1008_v14 = vmul.f32 0.25, %v565_v1  ;;  %v1422_v8 = vadd.f32 %v1358_v3, %v1230_v56  ;;  %v327_v16 = vmax.f32 %v74_v55, %v75_v60  ;;  %v1706_v17 = vmax.f32 %v89_v34, %v90_v2  ;;  %v78_v56 = vld [vmem:[#allocation2 + $0x37] sm:$0x1]  ;;  %v94_v3 = vld [vmem:[#allocation2 + $0x47] sm:$0x1] }
  0x3c   :  { %v1120_v15 = vadd.f32 %v1000_v10, %v760_v6  ;;  %v1423_v25 = vadd.f32 %v1359_v13, %v1231_v5  ;;  %v1710_v28 = vmax.f32 %v90_v2, %v91_v0  ;;  %v551_v30 = vmax.f32 %v1635_v31, %v326_v12  ;;  %v95_v5 = vld [vmem:[#allocation2 + $0x48] sm:$0x1] }
  0x3d   :  { %v1708_v27 = vadd.f32 %v1008_v14, %v768_v11  ;;  %1486 = vst [vmem:[#allocation5 + $0x6] sm:$0x1] %v1422_v8  ;;  %v552_v20 = vmax.f32 %v1637_v32, %v327_v16  ;;  %v566_v38 = vmax.f32 %v326_v12, %v1706_v17  ;;  %v328_v39 = vmax.f32 %v75_v60, %v76_v18 }
  0x3e   :  { %v1232_v37 = vmul.f32 0.5, %v1120_v15  ;;  %1487 = vst [vmem:[#allocation5 + $0x7] sm:$0x1] %v1423_v25  ;;  %v567_v41 = vmax.f32 %v327_v16, %v1710_v28  ;;  %v761_v42 = vmul.f32 0.5, %v551_v30  ;;  %v329_v46 = vmax.f32 %v76_v18, %v77_v24 }
  0x3f   :  { %v1296_v34 = vadd.f32 %v1708_v27, %v1641_v45  ;;  %v769_v29 = vmul.f32 0.5, %v566_v38  ;;  %v881_v44 = vadd.f32 %v552_v20, %v550_v53  ;;  %v1718_v31 = vmax.f32 %v91_v0, %v92_v33  ;;  %v80_v38 = vld [vmem:[#allocation2 + $0x39] sm:$0x1] }
  0x40   :  { %v1720_v47 = vmax.f32 %v92_v33, %v93_v35  ;;  %v889_v52 = vadd.f32 %v567_v41, %v565_v1  ;;  %v553_v32 = vmax.f32 %v1644_v58, %v328_v39  ;;  %v554_v55 = vmax.f32 %v1646_v62, %v329_v46 }
  0x41   :  { %v1360_v50 = vmul.f32 0.25, %v1296_v34  ;;  %v1001_v60 = vmul.f32 0.25, %v881_v44  ;;  %v568_v45 = vmax.f32 %v328_v39, %v1718_v31  ;;  %v330_v53 = vmax.f32 %v77_v24, %v78_v56  ;;  %v81_v39 = vld [vmem:[#allocation2 + $0x3a] sm:$0x1] }
  0x42   :  { %v569_v2 = vmax.f32 %v329_v46, %v1720_v47  ;;  %v1009_v10 = vmul.f32 0.25, %v889_v52  ;;  %v762_v0 = vmul.f32 0.5, %v553_v32  ;;  %v882_v13 = vadd.f32 %v554_v55, %v552_v20  ;;  %v97_v46 = vld [vmem:[#allocation2 + $0x4a] sm:$0x1] }
  0x43   :  { %v1424_v6 = vadd.f32 %v1360_v50, %v1232_v37  ;;  %v1121_v11 = vadd.f32 %v1001_v60, %v761_v42  ;;  %v770_v1 = vmul.f32 0.5, %v568_v45  ;;  %v331_v58 = vmax.f32 %v78_v56, %v79_v61  ;;  %v96_v42 = vld [vmem:[#allocation2 + $0x49] sm:$0x1] }
  0x44   :  { %v890_v14 = vadd.f32 %v569_v2, %v567_v41  ;;  %v1726_v62 = vadd.f32 %v1009_v10, %v769_v29  ;;  %v1002_v12 = vmul.f32 0.25, %v882_v13  ;;  %v1728_v8 = vmax.f32 %v93_v35, %v94_v3 }
  0x45   :  { %1488 = vst [vmem:[#allocation5 + $0x8] sm:$0x1] %v1424_v6  ;;  %v1730_v15 = vmax.f32 %v94_v3, %v95_v5  ;;  %v1233_v16 = vmul.f32 0.5, %v1121_v11  ;;  %v555_v24 = vmax.f32 %v1653_v22, %v330_v53  ;;  %v556_v25 = vmax.f32 %v1655_v26, %v331_v58  ;;  %v98_v11 = vld [vmem:[#allocation2 + $0x4b] sm:$0x1] }
  0x46   :  { %v1010_v18 = vmul.f32 0.25, %v890_v14  ;;  %v1297_v30 = vadd.f32 %v1726_v62, %v1649_v7  ;;  %v1122_v33 = vadd.f32 %v1002_v12, %v762_v0  ;;  %v570_v37 = vmax.f32 %v330_v53, %v1728_v8  ;;  %v83_v0 = vld [vmem:[#allocation2 + $0x3c] sm:$0x1] }
  0x47   :  { %v571_v20 = vmax.f32 %v331_v58, %v1730_v15  ;;  %v763_v34 = vmul.f32 0.5, %v555_v24  ;;  %v883_v41 = vadd.f32 %v556_v25, %v554_v55  ;;  %v332_v29 = vmax.f32 %v79_v61, %v80_v38 }
  0x48   :  { %v1738_v35 = vadd.f32 %v1010_v18, %v770_v1  ;;  %v1361_v22 = vmul.f32 0.25, %v1297_v30  ;;  %v1234_v44 = vmul.f32 0.5, %v1122_v33  ;;  %v771_v26 = vmul.f32 0.5, %v570_v37  ;;  %v99_v1 = vld [vmem:[#allocation2 + $0x4c] sm:$0x1] }
  0x49   :  { %v891_v50 = vadd.f32 %v571_v20, %v569_v2  ;;  %v1003_v52 = vmul.f32 0.25, %v883_v41  ;;  %v333_v32 = vmax.f32 %v80_v38, %v81_v39  ;;  %v1742_v56 = vmax.f32 %v95_v5, %v96_v42  ;;  %v82_v2 = vld [vmem:[#allocation2 + $0x3b] sm:$0x1]  ;;  %v84_v33 = vld [vmem:[#allocation2 + $0x3d] sm:$0x1] }
  0x4a   :  { %v1298_v7 = vadd.f32 %v1738_v35, %v1659_v43  ;;  %v1425_v60 = vadd.f32 %v1361_v22, %v1233_v16  ;;  %v1744_v3 = vmax.f32 %v96_v42, %v97_v46  ;;  %v557_v55 = vmax.f32 %v1661_v51, %v332_v29  ;;  %v85_v37 = vld [vmem:[#allocation2 + $0x3e] sm:$0x1] }
  0x4b   :  { %v1011_v45 = vmul.f32 0.25, %v891_v50  ;;  %v1123_v6 = vadd.f32 %v1003_v52, %v763_v34  ;;  %v558_v61 = vmax.f32 %v1664_v54, %v333_v32  ;;  %v572_v10 = vmax.f32 %v332_v29, %v1742_v56 }
  0x4c   :  { %v1362_v53 = vmul.f32 0.25, %v1298_v7  ;;  %1489 = vst [vmem:[#allocation5 + $0x9] sm:$0x1] %v1425_v60  ;;  %v573_v5 = vmax.f32 %v333_v32, %v1744_v3  ;;  %v764_v13 = vmul.f32 0.5, %v557_v55  ;;  %v334_v14 = vmax.f32 %v81_v39, %v82_v2 }
  0x4d   :  { %v1749_v43 = vadd.f32 %v1011_v45, %v771_v26  ;;  %v1235_v12 = vmul.f32 0.5, %v1123_v6  ;;  %v772_v51 = vmul.f32 0.5, %v572_v10  ;;  %v884_v16 = vadd.f32 %v558_v61, %v556_v25 }
  0x4e   :  { %v1426_v58 = vadd.f32 %v1362_v53, %v1234_v44  ;;  %v892_v18 = vadd.f32 %v573_v5, %v571_v20  ;;  %v335_v24 = vmax.f32 %v82_v2, %v83_v0  ;;  %v1754_v30 = vmax.f32 %v97_v46, %v98_v11  ;;  %v101_v20 = vld [vmem:[#allocation2 + $0x4e] sm:$0x1] }
  0x4f   :  { %v1299_v54 = vadd.f32 %v1749_v43, %v1668_v9  ;;  %v1004_v38 = vmul.f32 0.25, %v884_v16  ;;  %v1756_v34 = vmax.f32 %v98_v11, %v99_v1  ;;  %v559_v41 = vmax.f32 %v1671_v21, %v334_v14  ;;  %v100_v9 = vld [vmem:[#allocation2 + $0x4d] sm:$0x1]  ;;  %v86_v21 = vld [vmem:[#allocation2 + $0x3f] sm:$0x1] }
  0x50   :  { %1490 = vst [vmem:[#allocation5 + $0xa] sm:$0x1] %v1426_v58  ;;  %v336_v39 = vmax.f32 %v83_v0, %v84_v33  ;;  %v1012_v29 = vmul.f32 0.25, %v892_v18  ;;  %v560_v25 = vmax.f32 %v1673_v23, %v335_v24  ;;  %v574_v22 = vmax.f32 %v334_v14, %v1754_v30 }
  0x51   :  { %v1363_v42 = vmul.f32 0.25, %v1299_v54  ;;  %v1124_v44 = vadd.f32 %v1004_v38, %v764_v13  ;;  %v575_v46 = vmax.f32 %v335_v24, %v1756_v34  ;;  %v765_v26 = vmul.f32 0.5, %v559_v41  ;;  %v102_v13 = vld [vmem:[#allocation2 + $0x4f] sm:$0x1]  ;;  %v104_v24 = vld [vmem:[#allocation2 + $0x51] sm:$0x1] }
  0x52   :  { %v337_v50 = vmax.f32 %v84_v33, %v85_v37  ;;  %v1762_v52 = vadd.f32 %v1012_v29, %v772_v51  ;;  %v773_v32 = vmul.f32 0.5, %v574_v22  ;;  %v885_v60 = vadd.f32 %v560_v25, %v558_v61 }
  0x53   :  { %v1427_v7 = vadd.f32 %v1363_v42, %v1235_v12  ;;  %v1236_v45 = vmul.f32 0.5, %v1124_v44  ;;  %v893_v55 = vadd.f32 %v575_v46, %v573_v5  ;;  %v1764_v53 = vmax.f32 %v99_v1, %v100_v9  ;;  %v119_v42 = vld [vmem:[#allocation2 + $0x60] sm:$0x1]  ;;  %v121_v44 = vld [vmem:[#allocation2 + $0x62] sm:$0x1] }
  0x54   :  { %v1766_v23 = vmax.f32 %v100_v9, %v101_v20  ;;  %v1300_v6 = vadd.f32 %v1762_v52, %v1677_v40  ;;  %v1005_v10 = vmul.f32 0.25, %v885_v60  ;;  %v561_v2 = vmax.f32 %v1680_v57, %v336_v39  ;;  %v103_v57 = vld [vmem:[#allocation2 + $0x50] sm:$0x1]  ;;  %v120_v9 = vld [vmem:[#allocation2 + $0x61] sm:$0x1] }
  0x55   :  { %1491 = vst [vmem:[#allocation5 + $0xb] sm:$0x1] %v1427_v7  ;;  %v562_v0 = vmax.f32 %v1682_v63, %v337_v50  ;;  %v1013_v11 = vmul.f32 0.25, %v893_v55  ;;  %v576_v61 = vmax.f32 %v336_v39, %v1764_v53  ;;  %v338_v5 = vmax.f32 %v85_v37, %v86_v21  ;;  %v105_v39 = vld [vmem:[#allocation2 + $0x52] sm:$0x1] }
  0x56   :  { %v577_v14 = vmax.f32 %v337_v50, %v1766_v23  ;;  %v1364_v1 = vmul.f32 0.25, %v1300_v6  ;;  %v1125_v58 = vadd.f32 %v1005_v10, %v765_v26  ;;  %v766_v12 = vmul.f32 0.5, %v561_v2 }
  0x57   :  { %v886_v51 = vadd.f32 %v562_v0, %v560_v25  ;;  %v1774_v16 = vadd.f32 %v1013_v11, %v773_v32  ;;  %v774_v54 = vmul.f32 0.5, %v576_v61  ;;  %v1776_v18 = vmax.f32 %v101_v20, %v102_v13  ;;  %v106_v13 = vld [vmem:[#allocation2 + $0x53] sm:$0x1]  ;;  %v107_v11 = vld [vmem:[#allocation2 + $0x54] sm:$0x1] }
  0x58   :  { %v894_v40 = vadd.f32 %v577_v14, %v575_v46  ;;  %v1428_v63 = vadd.f32 %v1364_v1, %v1236_v45  ;;  %v1237_v33 = vmul.f32 0.5, %v1125_v58  ;;  %v563_v41 = vmax.f32 %v1688_v19, %v338_v5  ;;  %v122_v58 = vld [vmem:[#allocation2 + $0x63] sm:$0x1] }
  0x59   :  { %v1006_v38 = vmul.f32 0.25, %v886_v51  ;;  %v1301_v37 = vadd.f32 %v1774_v16, %v1685_v4  ;;  %v578_v25 = vmax.f32 %v338_v5, %v1776_v18  ;;  %v1007_v22 = vmul.f32 0.25, %v562_v0 }
  0x5a   :  { %v1014_v29 = vmul.f32 0.25, %v894_v40  ;;  %1492 = vst [vmem:[#allocation5 + $0xc] sm:$0x1] %v1428_v63  ;;  %v767_v46 = vmul.f32 0.5, %v563_v41  ;;  %v1015_v26 = vmul.f32 0.25, %v577_v14  ;;  %v354_v50 = vmax.f32 %v103_v57, %v104_v24 }
  0x5b   :  { %v1126_v20 = vadd.f32 %v1006_v38, %v766_v12  ;;  %v1365_v7 = vmul.f32 0.25, %v1301_v37  ;;  %v775_v19 = vmul.f32 0.5, %v578_v25  ;;  %v355_v60 = vmax.f32 %v104_v24, %v105_v39  ;;  %v123_v12 = vld [vmem:[#allocation2 + $0x64] sm:$0x1] }
  0x5c   :  { %v1782_v32 = vadd.f32 %v1014_v29, %v774_v54  ;;  %v1127_v45 = vadd.f32 %v1007_v22, %v767_v46  ;;  %v1784_v55 = vmax.f32 %v119_v42, %v120_v9  ;;  %v1786_v4 = vmax.f32 %v120_v9, %v121_v44  ;;  %v109_v22 = vld [vmem:[#allocation2 + $0x56] sm:$0x1]  ;;  %v124_v46 = vld [vmem:[#allocation2 + $0x65] sm:$0x1] }
  0x5d   :  { %v1238_v21 = vmul.f32 0.5, %v1126_v20  ;;  %v1429_v6 = vadd.f32 %v1365_v7, %v1237_v33  ;;  %v1790_v2 = vadd.f32 %v1015_v26, %v775_v19  ;;  %v579_v0 = vmax.f32 %v1692_v48, %v354_v50 }
  0x5e   :  { %v1302_v10 = vadd.f32 %v1782_v32, %v1696_v36  ;;  %v1239_v61 = vmul.f32 0.5, %v1127_v45  ;;  %v580_v14 = vmax.f32 %v1694_v49, %v355_v60  ;;  %v594_v5 = vmax.f32 %v354_v50, %v1784_v55 }
  0x5f   :  { %v595_v1 = vmax.f32 %v355_v60, %v1786_v4  ;;  %1493 = vst [vmem:[#allocation5 + $0xd] sm:$0x1] %v1429_v6  ;;  %v1303_v36 = vadd.f32 %v1790_v2, %v1700_v59  ;;  %v776_v54 = vmul.f32 0.5, %v579_v0  ;;  %v356_v40 = vmax.f32 %v105_v39, %v106_v13  ;;  %v108_v59 = vld [vmem:[#allocation2 + $0x55] sm:$0x1] }
  0x60   :  { %v1366_v51 = vmul.f32 0.25, %v1302_v10  ;;  %v784_v57 = vmul.f32 0.5, %v594_v5  ;;  %v1016_v48 = vmul.f32 0.25, %v580_v14  ;;  %v357_v63 = vmax.f32 %v106_v13, %v107_v11 }
  0x61   :  { %v1024_v24 = vmul.f32 0.25, %v595_v1  ;;  %v1367_v38 = vmul.f32 0.25, %v1303_v36  ;;  %v1798_v49 = vmax.f32 %v121_v44, %v122_v58  ;;  %v1800_v41 = vmax.f32 %v122_v58, %v123_v12  ;;  %v125_v44 = vld [vmem:[#allocation2 + $0x66] sm:$0x1] }
  0x62   :  { %v1430_v33 = vadd.f32 %v1366_v51, %v1238_v21  ;;  %v1136_v42 = vadd.f32 %v1016_v48, %v776_v54  ;;  %v581_v29 = vmax.f32 %v1706_v17, %v356_v40  ;;  %v582_v25 = vmax.f32 %v1710_v28, %v357_v63  ;;  %v127_v51 = vld [vmem:[#allocation2 + $0x68] sm:$0x1] }
  0x63   :  { %v1802_v37 = vadd.f32 %v1024_v24, %v784_v57  ;;  %v1431_v39 = vadd.f32 %v1367_v38, %v1239_v61  ;;  %v596_v9 = vmax.f32 %v356_v40, %v1798_v49  ;;  %v597_v20 = vmax.f32 %v357_v63, %v1800_v41  ;;  %v110_v61 = vld [vmem:[#allocation2 + $0x57] sm:$0x1] }
  0x64   :  { %1494 = vst [vmem:[#allocation5 + $0xe] sm:$0x1] %v1430_v33  ;;  %v358_v26 = vmax.f32 %v107_v11, %v108_v59  ;;  %v1240_v50 = vmul.f32 0.5, %v1136_v42  ;;  %v777_v19 = vmul.f32 0.5, %v581_v29  ;;  %v897_v60 = vadd.f32 %v582_v25, %v580_v14  ;;  %v111_v11 = vld [vmem:[#allocation2 + $0x58] sm:$0x1] }
  0x65   :  { %v1304_v7 = vadd.f32 %v1802_v37, %v1708_v27  ;;  %1495 = vst [vmem:[#allocation5 + $0xf] sm:$0x1] %v1431_v39  ;;  %v785_v17 = vmul.f32 0.5, %v596_v9  ;;  %v905_v28 = vadd.f32 %v597_v20, %v595_v1  ;;  %v359_v21 = vmax.f32 %v108_v59, %v109_v22  ;;  %v126_v14 = vld [vmem:[#allocation2 + $0x67] sm:$0x1] }
  0x66   :  { %v1810_v45 = vmax.f32 %v123_v12, %v124_v46  ;;  %v1017_v10 = vmul.f32 0.25, %v897_v60  ;;  %v1812_v0 = vmax.f32 %v124_v46, %v125_v44  ;;  %v583_v13 = vmax.f32 %v1718_v31, %v358_v26  ;;  %v112_v39 = vld [vmem:[#allocation2 + $0x59] sm:$0x1]  ;;  %v113_v9 = vld [vmem:[#allocation2 + $0x5a] sm:$0x1] }
  0x67   :  { %v1368_v6 = vmul.f32 0.25, %v1304_v7  ;;  %v1025_v5 = vmul.f32 0.25, %v905_v28  ;;  %v584_v58 = vmax.f32 %v1720_v47, %v359_v21  ;;  %v360_v36 = vmax.f32 %v109_v22, %v110_v61  ;;  %v128_v60 = vld [vmem:[#allocation2 + $0x69] sm:$0x1] }
  0x68   :  { %v598_v27 = vmax.f32 %v358_v26, %v1810_v45  ;;  %v1137_v54 = vadd.f32 %v1017_v10, %v777_v19  ;;  %v599_v12 = vmax.f32 %v359_v21, %v1812_v0  ;;  %v778_v40 = vmul.f32 0.5, %v583_v13 }
  0x69   :  { %v1432_v1 = vadd.f32 %v1368_v6, %v1240_v50  ;;  %v1818_v57 = vadd.f32 %v1025_v5, %v785_v17  ;;  %v898_v24 = vadd.f32 %v584_v58, %v582_v25  ;;  %v361_v31 = vmax.f32 %v110_v61, %v111_v11  ;;  %v129_v17 = vld [vmem:[#allocation2 + $0x6a] sm:$0x1] }
  0x6a   :  { %v786_v48 = vmul.f32 0.5, %v598_v27  ;;  %v1241_v63 = vmul.f32 0.5, %v1137_v54  ;;  %v906_v33 = vadd.f32 %v599_v12, %v597_v20  ;;  %v1820_v38 = vmax.f32 %v125_v44, %v126_v14  ;;  %v114_v27 = vld [vmem:[#allocation2 + $0x5b] sm:$0x1] }
  0x6b   :  { %1496 = vst [vmem:[#allocation5 + $0x10] sm:$0x1] %v1432_v1  ;;  %v1822_v47 = vmax.f32 %v126_v14, %v127_v51  ;;  %v1305_v42 = vadd.f32 %v1818_v57, %v1726_v62  ;;  %v1018_v29 = vmul.f32 0.25, %v898_v24  ;;  %v585_v59 = vmax.f32 %v1728_v8, %v360_v36  ;;  %v115_v14 = vld [vmem:[#allocation2 + $0x5c] sm:$0x1] }
  0x6c   :  { %v586_v22 = vmax.f32 %v1730_v15, %v361_v31  ;;  %v1026_v46 = vmul.f32 0.25, %v906_v33  ;;  %v600_v25 = vmax.f32 %v360_v36, %v1820_v38  ;;  %v362_v20 = vmax.f32 %v111_v11, %v112_v39  ;;  %v130_v24 = vld [vmem:[#allocation2 + $0x6b] sm:$0x1] }
  0x6d   :  { %v601_v26 = vmax.f32 %v361_v31, %v1822_v47  ;;  %v1369_v44 = vmul.f32 0.25, %v1305_v42  ;;  %v1138_v50 = vadd.f32 %v1018_v29, %v778_v40  ;;  %v779_v7 = vmul.f32 0.5, %v585_v59  ;;  %v131_v31 = vld [vmem:[#allocation2 + $0x6c] sm:$0x1] }
  0x6e   :  { %v899_v19 = vadd.f32 %v586_v22, %v584_v58  ;;  %v1830_v62 = vadd.f32 %v1026_v46, %v786_v48  ;;  %v787_v28 = vmul.f32 0.5, %v600_v25  ;;  %v363_v21 = vmax.f32 %v112_v39, %v113_v9 }
  0x6f   :  { %v907_v8 = vadd.f32 %v601_v26, %v599_v12  ;;  %v1433_v15 = vadd.f32 %v1369_v44, %v1241_v63  ;;  %v1242_v6 = vmul.f32 0.5, %v1138_v50  ;;  %v1832_v13 = vmax.f32 %v127_v51, %v128_v60  ;;  %v116_v44 = vld [vmem:[#allocation2 + $0x5d] sm:$0x1]  ;;  %v117_v50 = vld [vmem:[#allocation2 + $0x5e] sm:$0x1] }
  0x70   :  { %v1019_v10 = vmul.f32 0.25, %v899_v19  ;;  %v1306_v61 = vadd.f32 %v1830_v62, %v1738_v35  ;;  %v1836_v5 = vmax.f32 %v128_v60, %v129_v17  ;;  %v587_v58 = vmax.f32 %v1742_v56, %v362_v20 }
  0x71   :  { %v1027_v11 = vmul.f32 0.25, %v907_v8  ;;  %1497 = vst [vmem:[#allocation5 + $0x11] sm:$0x1] %v1433_v15  ;;  %v588_v1 = vmax.f32 %v1744_v3, %v363_v21  ;;  %v602_v54 = vmax.f32 %v362_v20, %v1832_v13  ;;  %v364_v12 = vmax.f32 %v113_v9, %v114_v27  ;;  %v132_v8 = vld [vmem:[#allocation2 + $0x6d] sm:$0x1] }
  0x72   :  { %v1139_v36 = vadd.f32 %v1019_v10, %v779_v7  ;;  %v1370_v40 = vmul.f32 0.25, %v1306_v61  ;;  %v603_v48 = vmax.f32 %v363_v21, %v1836_v5  ;;  %v780_v35 = vmul.f32 0.5, %v587_v58  ;;  %v133_v21 = vld [vmem:[#allocation2 + $0x6e] sm:$0x1]  ;;  %v118_v10 = vld [vmem:[#allocation2 + $0x5f] sm:$0x1] }
  0x73   :  { %v1841_v51 = vadd.f32 %v1027_v11, %v787_v28  ;;  %v788_v33 = vmul.f32 0.5, %v602_v54  ;;  %v900_v56 = vadd.f32 %v588_v1, %v586_v22  ;;  %v365_v42 = vmax.f32 %v114_v27, %v115_v14 }
  0x74   :  { %v1243_v63 = vmul.f32 0.5, %v1139_v36  ;;  %v1434_v29 = vadd.f32 %v1370_v40, %v1242_v6  ;;  %v908_v3 = vadd.f32 %v603_v48, %v601_v26  ;;  %v1846_v39 = vmax.f32 %v129_v17, %v130_v24 }
  0x75   :  { %v1307_v59 = vadd.f32 %v1841_v51, %v1749_v43  ;;  %v1020_v9 = vmul.f32 0.25, %v900_v56  ;;  %v1848_v46 = vmax.f32 %v130_v24, %v131_v31  ;;  %v589_v25 = vmax.f32 %v1754_v30, %v364_v12 }
  0x76   :  { %v590_v20 = vmax.f32 %v1756_v34, %v365_v42  ;;  %1498 = vst [vmem:[#allocation5 + $0x12] sm:$0x1] %v1434_v29  ;;  %v1028_v22 = vmul.f32 0.25, %v908_v3  ;;  %v604_v19 = vmax.f32 %v364_v12, %v1846_v39  ;;  %v366_v60 = vmax.f32 %v115_v14, %v116_v44  ;;  %v134_v12 = vld [vmem:[#allocation2 + $0x6f] sm:$0x1] }
  0x77   :  { %v1371_v7 = vmul.f32 0.25, %v1307_v59  ;;  %v1140_v28 = vadd.f32 %v1020_v9, %v780_v35  ;;  %v605_v43 = vmax.f32 %v365_v42, %v1848_v46  ;;  %v781_v26 = vmul.f32 0.5, %v589_v25  ;;  %v136_v3 = vld [vmem:[#allocation2 + $0x71] sm:$0x1] }
  0x78   :  { %v901_v17 = vadd.f32 %v590_v20, %v588_v1  ;;  %v1854_v6 = vadd.f32 %v1028_v22, %v788_v33  ;;  %v789_v30 = vmul.f32 0.5, %v604_v19  ;;  %v367_v34 = vmax.f32 %v116_v44, %v117_v50 }
  0x79   :  { %v1435_v15 = vadd.f32 %v1371_v7, %v1243_v63  ;;  %v1244_v61 = vmul.f32 0.5, %v1140_v28  ;;  %v909_v11 = vadd.f32 %v605_v43, %v603_v48  ;;  %v1856_v27 = vmax.f32 %v131_v31, %v132_v8  ;;  %v137_v7 = vld [vmem:[#allocation2 + $0x72] sm:$0x1]  ;;  %v152_v28 = vld [vmem:[#allocation2 + $0x81] sm:$0x1] }
  0x7a   :  { %v1021_v58 = vmul.f32 0.25, %v901_v17  ;;  %v1308_v14 = vadd.f32 %v1854_v6, %v1762_v52  ;;  %v1860_v36 = vmax.f32 %v132_v8, %v133_v21  ;;  %v591_v1 = vmax.f32 %v1764_v53, %v366_v60  ;;  %v135_v53 = vld [vmem:[#allocation2 + $0x70] sm:$0x1] }
  0x7b   :  { %1499 = vst [vmem:[#allocation5 + $0x13] sm:$0x1] %v1435_v15  ;;  %v592_v54 = vmax.f32 %v1766_v23, %v367_v34  ;;  %v1029_v40 = vmul.f32 0.25, %v909_v11  ;;  %v606_v24 = vmax.f32 %v366_v60, %v1856_v27  ;;  %v368_v63 = vmax.f32 %v117_v50, %v118_v10  ;;  %v151_v50 = vld [vmem:[#allocation2 + $0x80] sm:$0x1] }
  0x7c   :  { %v1141_v35 = vadd.f32 %v1021_v58, %v781_v26  ;;  %v1372_v48 = vmul.f32 0.25, %v1308_v14  ;;  %v607_v31 = vmax.f32 %v367_v34, %v1860_v36  ;;  %v782_v33 = vmul.f32 0.5, %v591_v1  ;;  %v153_v26 = vld [vmem:[#allocation2 + $0x82] sm:$0x1] }
  0x7d   :  { %v902_v56 = vadd.f32 %v592_v54, %v590_v20  ;;  %v1866_v42 = vadd.f32 %v1029_v40, %v789_v30  ;;  %v790_v29 = vmul.f32 0.5, %v606_v24  ;;  %v1868_v59 = vmax.f32 %v133_v21, %v134_v12  ;;  %v138_v12 = vld [vmem:[#allocation2 + $0x73] sm:$0x1]  ;;  %v139_v40 = vld [vmem:[#allocation2 + $0x74] sm:$0x1] }
  0x7e   :  { %v1245_v52 = vmul.f32 0.5, %v1141_v35  ;;  %v1436_v23 = vadd.f32 %v1372_v48, %v1244_v61  ;;  %v910_v9 = vadd.f32 %v607_v31, %v605_v43  ;;  %v593_v44 = vmax.f32 %v1776_v18, %v368_v63 }
  0x7f   :  { %v1022_v25 = vmul.f32 0.25, %v902_v56  ;;  %v1309_v22 = vadd.f32 %v1866_v42, %v1774_v16  ;;  %v608_v20 = vmax.f32 %v368_v63, %v1868_v59  ;;  %v1023_v19 = vmul.f32 0.25, %v592_v54 }
  0x80   :  { %v1031_v60 = vmul.f32 0.25, %v607_v31  ;;  %1500 = vst [vmem:[#allocation5 + $0x14] sm:$0x1] %v1436_v23  ;;  %v1030_v17 = vmul.f32 0.25, %v910_v9  ;;  %v783_v21 = vmul.f32 0.5, %v593_v44  ;;  %v384_v15 = vmax.f32 %v135_v53, %v136_v3 }
  0x81   :  { %v1142_v8 = vadd.f32 %v1022_v25, %v782_v33  ;;  %v1373_v43 = vmul.f32 0.25, %v1309_v22  ;;  %v791_v30 = vmul.f32 0.5, %v608_v20  ;;  %v385_v34 = vmax.f32 %v136_v3, %v137_v7  ;;  %v154_v31 = vld [vmem:[#allocation2 + $0x83] sm:$0x1]  ;;  %v155_v33 = vld [vmem:[#allocation2 + $0x84] sm:$0x1] }
  0x82   :  { %v1874_v18 = vmax.f32 %v151_v50, %v152_v28  ;;  %v1876_v10 = vadd.f32 %v1030_v17, %v790_v29  ;;  %v1143_v16 = vadd.f32 %v1023_v19, %v783_v21  ;;  %v1878_v11 = vmax.f32 %v152_v28, %v153_v26  ;;  %v140_v19 = vld [vmem:[#allocation2 + $0x75] sm:$0x1]  ;;  %v156_v21 = vld [vmem:[#allocation2 + $0x85] sm:$0x1] }
  0x83   :  { %v1246_v61 = vmul.f32 0.5, %v1142_v8  ;;  %v1437_v58 = vadd.f32 %v1373_v43, %v1245_v52  ;;  %v1880_v14 = vadd.f32 %v1031_v60, %v791_v30  ;;  %v609_v1 = vmax.f32 %v1784_v55, %v384_v15  ;;  %v141_v60 = vld [vmem:[#allocation2 + $0x76] sm:$0x1] }
  0x84   :  { %v610_v54 = vmax.f32 %v1786_v4, %v385_v34  ;;  %v1310_v35 = vadd.f32 %v1876_v10, %v1782_v32  ;;  %v1247_v24 = vmul.f32 0.5, %v1143_v16  ;;  %v624_v63 = vmax.f32 %v384_v15, %v1874_v18 }
  0x85   :  { %v625_v48 = vmax.f32 %v385_v34, %v1878_v11  ;;  %1501 = vst [vmem:[#allocation5 + $0x15] sm:$0x1] %v1437_v58  ;;  %v1311_v56 = vadd.f32 %v1880_v14, %v1790_v2  ;;  %v792_v52 = vmul.f32 0.5, %v609_v1  ;;  %v386_v29 = vmax.f32 %v137_v7, %v138_v12 }
  0x86   :  { %v1032_v55 = vmul.f32 0.25, %v610_v54  ;;  %v1374_v4 = vmul.f32 0.25, %v1310_v35  ;;  %v800_v53 = vmul.f32 0.5, %v624_v63  ;;  %v387_v23 = vmax.f32 %v138_v12, %v139_v40  ;;  %v143_v63 = vld [vmem:[#allocation2 + $0x78] sm:$0x1] }
  0x87   :  { %v1040_v3 = vmul.f32 0.25, %v625_v48  ;;  %v1375_v9 = vmul.f32 0.25, %v1311_v56  ;;  %v1890_v25 = vmax.f32 %v153_v26, %v154_v31  ;;  %v1892_v44 = vmax.f32 %v154_v31, %v155_v33  ;;  %v157_v26 = vld [vmem:[#allocation2 + $0x86] sm:$0x1]  ;;  %v159_v56 = vld [vmem:[#allocation2 + $0x88] sm:$0x1] }
  0x88   :  { %v1152_v32 = vadd.f32 %v1032_v55, %v792_v52  ;;  %v1438_v50 = vadd.f32 %v1374_v4, %v1246_v61  ;;  %v611_v20 = vmax.f32 %v1798_v49, %v386_v29  ;;  %v612_v2 = vmax.f32 %v1800_v41, %v387_v23 }
  0x89   :  { %v1894_v22 = vadd.f32 %v1040_v3, %v800_v53  ;;  %v1439_v7 = vadd.f32 %v1375_v9, %v1247_v24  ;;  %v626_v17 = vmax.f32 %v386_v29, %v1890_v25  ;;  %v627_v8 = vmax.f32 %v387_v23, %v1892_v44  ;;  %v142_v24 = vld [vmem:[#allocation2 + $0x77] sm:$0x1] }
  0x8a   :  { %v1248_v28 = vmul.f32 0.5, %v1152_v32  ;;  %1502 = vst [vmem:[#allocation5 + $0x16] sm:$0x1] %v1438_v50  ;;  %v793_v43 = vmul.f32 0.5, %v611_v20  ;;  %v913_v30 = vadd.f32 %v612_v2, %v610_v54  ;;  %v388_v34 = vmax.f32 %v139_v40, %v140_v19  ;;  %v158_v40 = vld [vmem:[#allocation2 + $0x87] sm:$0x1] }
  0x8b   :  { %v1312_v15 = vadd.f32 %v1894_v22, %v1802_v37  ;;  %1503 = vst [vmem:[#allocation5 + $0x17] sm:$0x1] %v1439_v7  ;;  %v801_v49 = vmul.f32 0.5, %v626_v17  ;;  %v921_v41 = vadd.f32 %v627_v8, %v625_v48  ;;  %v389_v61 = vmax.f32 %v140_v19, %v141_v60  ;;  %v144_v7 = vld [vmem:[#allocation2 + $0x79] sm:$0x1] }
  0x8c   :  { %v1902_v16 = vmax.f32 %v155_v33, %v156_v21  ;;  %v1033_v1 = vmul.f32 0.25, %v913_v30  ;;  %v1904_v12 = vmax.f32 %v156_v21, %v157_v26  ;;  %v613_v35 = vmax.f32 %v1810_v45, %v388_v34 }
  0x8d   :  { %v1376_v58 = vmul.f32 0.25, %v1312_v15  ;;  %v1041_v31 = vmul.f32 0.25, %v921_v41  ;;  %v614_v37 = vmax.f32 %v1812_v0, %v389_v61  ;;  %v390_v52 = vmax.f32 %v141_v60, %v142_v24 }
  0x8e   :  { %v628_v54 = vmax.f32 %v388_v34, %v1902_v16  ;;  %v1153_v55 = vadd.f32 %v1033_v1, %v793_v43  ;;  %v629_v33 = vmax.f32 %v389_v61, %v1904_v12  ;;  %v794_v29 = vmul.f32 0.5, %v613_v35  ;;  %v160_v34 = vld [vmem:[#allocation2 + $0x89] sm:$0x1] }
  0x8f   :  { %v1440_v48 = vadd.f32 %v1376_v58, %v1248_v28  ;;  %v1910_v4 = vadd.f32 %v1041_v31, %v801_v49  ;;  %v914_v3 = vadd.f32 %v614_v37, %v612_v2  ;;  %v391_v45 = vmax.f32 %v142_v24, %v143_v63  ;;  %v145_v28 = vld [vmem:[#allocation2 + $0x7a] sm:$0x1]  ;;  %v161_v49 = vld [vmem:[#allocation2 + $0x8a] sm:$0x1] }
  0x90   :  { %v802_v53 = vmul.f32 0.5, %v628_v54  ;;  %v1249_v23 = vmul.f32 0.5, %v1153_v55  ;;  %v922_v9 = vadd.f32 %v629_v33, %v627_v8  ;;  %v1912_v32 = vmax.f32 %v157_v26, %v158_v40  ;;  %v146_v54 = vld [vmem:[#allocation2 + $0x7b] sm:$0x1] }
  0x91   :  { %1504 = vst [vmem:[#allocation5 + $0x18] sm:$0x1] %v1440_v48  ;;  %v1914_v0 = vmax.f32 %v158_v40, %v159_v56  ;;  %v1313_v50 = vadd.f32 %v1910_v4, %v1818_v57  ;;  %v1034_v20 = vmul.f32 0.25, %v914_v3  ;;  %v615_v19 = vmax.f32 %v1820_v38, %v390_v52  ;;  %v147_v40 = vld [vmem:[#allocation2 + $0x7c] sm:$0x1] }
  0x92   :  { %v616_v60 = vmax.f32 %v1822_v47, %v391_v45  ;;  %v1042_v17 = vmul.f32 0.25, %v922_v9  ;;  %v630_v2 = vmax.f32 %v390_v52, %v1912_v32  ;;  %v392_v8 = vmax.f32 %v143_v63, %v144_v7  ;;  %v162_v3 = vld [vmem:[#allocation2 + $0x8b] sm:$0x1] }
  0x93   :  { %v631_v21 = vmax.f32 %v391_v45, %v1914_v0  ;;  %v1377_v26 = vmul.f32 0.25, %v1313_v50  ;;  %v1154_v15 = vadd.f32 %v1034_v20, %v794_v29  ;;  %v795_v43 = vmul.f32 0.5, %v615_v19  ;;  %v163_v45 = vld [vmem:[#allocation2 + $0x8c] sm:$0x1] }
  0x94   :  { %v915_v30 = vadd.f32 %v616_v60, %v614_v37  ;;  %v1922_v57 = vadd.f32 %v1042_v17, %v802_v53  ;;  %v803_v41 = vmul.f32 0.5, %v630_v2  ;;  %v393_v61 = vmax.f32 %v144_v7, %v145_v28 }
  0x95   :  { %v923_v38 = vadd.f32 %v631_v21, %v629_v33  ;;  %v1441_v47 = vadd.f32 %v1377_v26, %v1249_v23  ;;  %v1250_v58 = vmul.f32 0.5, %v1154_v15  ;;  %v1924_v35 = vmax.f32 %v159_v56, %v160_v34  ;;  %v148_v26 = vld [vmem:[#allocation2 + $0x7d] sm:$0x1]  ;;  %v149_v15 = vld [vmem:[#allocation2 + $0x7e] sm:$0x1] }
  0x96   :  { %v1035_v1 = vmul.f32 0.25, %v915_v30  ;;  %v1314_v24 = vadd.f32 %v1922_v57, %v1830_v62  ;;  %v1928_v31 = vmax.f32 %v160_v34, %v161_v49  ;;  %v617_v37 = vmax.f32 %v1832_v13, %v392_v8 }
  0x97   :  { %v1043_v63 = vmul.f32 0.25, %v923_v38  ;;  %1505 = vst [vmem:[#allocation5 + $0x19] sm:$0x1] %v1441_v47  ;;  %v618_v48 = vmax.f32 %v1836_v5, %v393_v61  ;;  %v632_v55 = vmax.f32 %v392_v8, %v1924_v35  ;;  %v394_v33 = vmax.f32 %v145_v28, %v146_v54  ;;  %v164_v38 = vld [vmem:[#allocation2 + $0x8d] sm:$0x1] }
  0x98   :  { %v1155_v52 = vadd.f32 %v1035_v1, %v795_v43  ;;  %v1378_v29 = vmul.f32 0.25, %v1314_v24  ;;  %v633_v53 = vmax.f32 %v393_v61, %v1928_v31  ;;  %v796_v62 = vmul.f32 0.5, %v617_v37  ;;  %v165_v61 = vld [vmem:[#allocation2 + $0x8e] sm:$0x1]  ;;  %v150_v1 = vld [vmem:[#allocation2 + $0x7f] sm:$0x1] }
  0x99   :  { %v1933_v56 = vadd.f32 %v1043_v63, %v803_v41  ;;  %v804_v9 = vmul.f32 0.5, %v632_v55  ;;  %v916_v13 = vadd.f32 %v618_v48, %v616_v60  ;;  %v395_v50 = vmax.f32 %v146_v54, %v147_v40 }
  0x9a   :  { %v1251_v23 = vmul.f32 0.5, %v1155_v52  ;;  %v1442_v20 = vadd.f32 %v1378_v29, %v1250_v58  ;;  %v924_v5 = vadd.f32 %v633_v53, %v631_v21  ;;  %v1938_v7 = vmax.f32 %v161_v49, %v162_v3 }
  0x9b   :  { %v1315_v19 = vadd.f32 %v1933_v56, %v1841_v51  ;;  %v1036_v28 = vmul.f32 0.25, %v916_v13  ;;  %v1940_v17 = vmax.f32 %v162_v3, %v163_v45  ;;  %v619_v2 = vmax.f32 %v1846_v39, %v394_v33 }
  0x9c   :  { %v620_v8 = vmax.f32 %v1848_v46, %v395_v50  ;;  %1506 = vst [vmem:[#allocation5 + $0x1a] sm:$0x1] %v1442_v20  ;;  %v1044_v60 = vmul.f32 0.25, %v924_v5  ;;  %v634_v30 = vmax.f32 %v394_v33, %v1938_v7  ;;  %v396_v34 = vmax.f32 %v147_v40, %v148_v26  ;;  %v166_v33 = vld [vmem:[#allocation2 + $0x8f] sm:$0x1] }
  0x9d   :  { %v1379_v43 = vmul.f32 0.25, %v1315_v19  ;;  %v1156_v41 = vadd.f32 %v1036_v28, %v796_v62  ;;  %v635_v51 = vmax.f32 %v395_v50, %v1940_v17  ;;  %v797_v21 = vmul.f32 0.5, %v619_v2  ;;  %v168_v5 = vld [vmem:[#allocation2 + $0x91] sm:$0x1] }
  0x9e   :  { %v917_v49 = vadd.f32 %v620_v8, %v618_v48  ;;  %v1946_v58 = vadd.f32 %v1044_v60, %v804_v9  ;;  %v805_v39 = vmul.f32 0.5, %v634_v30  ;;  %v397_v46 = vmax.f32 %v148_v26, %v149_v15 }
  0x9f   :  { %v1443_v47 = vadd.f32 %v1379_v43, %v1251_v23  ;;  %v1252_v24 = vmul.f32 0.5, %v1156_v41  ;;  %v925_v63 = vadd.f32 %v635_v51, %v633_v53  ;;  %v1948_v54 = vmax.f32 %v163_v45, %v164_v38  ;;  %v169_v43 = vld [vmem:[#allocation2 + $0x92] sm:$0x1]  ;;  %v184_v41 = vld [vmem:[#allocation2 + $0xa1] sm:$0x1] }
  0xa0   :  { %v1037_v37 = vmul.f32 0.25, %v917_v49  ;;  %v1316_v40 = vadd.f32 %v1946_v58, %v1854_v6  ;;  %v1952_v52 = vmax.f32 %v164_v38, %v165_v61  ;;  %v621_v48 = vmax.f32 %v1856_v27, %v396_v34  ;;  %v167_v27 = vld [vmem:[#allocation2 + $0x90] sm:$0x1] }
  0xa1   :  { %1507 = vst [vmem:[#allocation5 + $0x1b] sm:$0x1] %v1443_v47  ;;  %v622_v55 = vmax.f32 %v1860_v36, %v397_v46  ;;  %v1045_v29 = vmul.f32 0.25, %v925_v63  ;;  %v636_v3 = vmax.f32 %v396_v34, %v1948_v54  ;;  %v398_v23 = vmax.f32 %v149_v15, %v150_v1  ;;  %v183_v15 = vld [vmem:[#allocation2 + $0xa0] sm:$0x1] }
  0xa2   :  { %v1157_v62 = vadd.f32 %v1037_v37, %v797_v21  ;;  %v1380_v53 = vmul.f32 0.25, %v1316_v40  ;;  %v637_v45 = vmax.f32 %v397_v46, %v1952_v52  ;;  %v798_v9 = vmul.f32 0.5, %v621_v48  ;;  %v185_v21 = vld [vmem:[#allocation2 + $0xa2] sm:$0x1] }
  0xa3   :  { %v918_v13 = vadd.f32 %v622_v55, %v620_v8  ;;  %v1958_v50 = vadd.f32 %v1045_v29, %v805_v39  ;;  %v806_v20 = vmul.f32 0.5, %v636_v3  ;;  %v1960_v19 = vmax.f32 %v165_v61, %v166_v33  ;;  %v170_v33 = vld [vmem:[#allocation2 + $0x93] sm:$0x1]  ;;  %v171_v29 = vld [vmem:[#allocation2 + $0x94] sm:$0x1] }
  0xa4   :  { %v1253_v6 = vmul.f32 0.5, %v1157_v62  ;;  %v1444_v36 = vadd.f32 %v1380_v53, %v1252_v24  ;;  %v926_v28 = vadd.f32 %v637_v45, %v635_v51  ;;  %v623_v26 = vmax.f32 %v1868_v59, %v398_v23 }
  0xa5   :  { %v1038_v2 = vmul.f32 0.25, %v918_v13  ;;  %v1317_v60 = vadd.f32 %v1958_v50, %v1866_v42  ;;  %v638_v8 = vmax.f32 %v398_v23, %v1960_v19  ;;  %v1039_v30 = vmul.f32 0.25, %v622_v55 }
  0xa6   :  { %v1047_v34 = vmul.f32 0.25, %v637_v45  ;;  %1508 = vst [vmem:[#allocation5 + $0x1c] sm:$0x1] %v1444_v36  ;;  %v1046_v49 = vmul.f32 0.25, %v926_v28  ;;  %v799_v61 = vmul.f32 0.5, %v623_v26  ;;  %v414_v47 = vmax.f32 %v167_v27, %v168_v5 }
  0xa7   :  { %v1158_v38 = vadd.f32 %v1038_v2, %v798_v9  ;;  %v1381_v51 = vmul.f32 0.25, %v1317_v60  ;;  %v807_v39 = vmul.f32 0.5, %v638_v8  ;;  %v415_v46 = vmax.f32 %v168_v5, %v169_v43  ;;  %v186_v45 = vld [vmem:[#allocation2 + $0xa3] sm:$0x1]  ;;  %v187_v9 = vld [vmem:[#allocation2 + $0xa4] sm:$0x1] }
  0xa8   :  { %v1966_v59 = vmax.f32 %v183_v15, %v184_v41  ;;  %v1968_v1 = vadd.f32 %v1046_v49, %v806_v20  ;;  %v1159_v42 = vadd.f32 %v1039_v30, %v799_v61  ;;  %v1970_v63 = vmax.f32 %v184_v41, %v185_v21  ;;  %v172_v30 = vld [vmem:[#allocation2 + $0x95] sm:$0x1]  ;;  %v188_v61 = vld [vmem:[#allocation2 + $0xa5] sm:$0x1] }
  0xa9   :  { %v1254_v24 = vmul.f32 0.5, %v1158_v38  ;;  %v1445_v37 = vadd.f32 %v1381_v51, %v1253_v6  ;;  %v1972_v40 = vadd.f32 %v1047_v34, %v807_v39  ;;  %v639_v48 = vmax.f32 %v1874_v18, %v414_v47  ;;  %v173_v34 = vld [vmem:[#allocation2 + $0x96] sm:$0x1] }
  0xaa   :  { %v640_v55 = vmax.f32 %v1878_v11, %v415_v46  ;;  %v1318_v62 = vadd.f32 %v1968_v1, %v1876_v10  ;;  %v1255_v3 = vmul.f32 0.5, %v1159_v42  ;;  %v654_v23 = vmax.f32 %v414_v47, %v1966_v59 }
  0xab   :  { %v655_v53 = vmax.f32 %v415_v46, %v1970_v63  ;;  %1509 = vst [vmem:[#allocation5 + $0x1d] sm:$0x1] %v1445_v37  ;;  %v1319_v13 = vadd.f32 %v1972_v40, %v1880_v14  ;;  %v808_v6 = vmul.f32 0.5, %v639_v48  ;;  %v416_v20 = vmax.f32 %v169_v43, %v170_v33 }
  0xac   :  { %v1048_v18 = vmul.f32 0.25, %v640_v55  ;;  %v1382_v11 = vmul.f32 0.25, %v1318_v62  ;;  %v816_v27 = vmul.f32 0.5, %v654_v23  ;;  %v417_v36 = vmax.f32 %v170_v33, %v171_v29  ;;  %v175_v23 = vld [vmem:[#allocation2 + $0x98] sm:$0x1] }
  0xad   :  { %v1056_v5 = vmul.f32 0.25, %v655_v53  ;;  %v1383_v28 = vmul.f32 0.25, %v1319_v13  ;;  %v1982_v2 = vmax.f32 %v185_v21, %v186_v45  ;;  %v1984_v26 = vmax.f32 %v186_v45, %v187_v9  ;;  %v189_v21 = vld [vmem:[#allocation2 + $0xa6] sm:$0x1]  ;;  %v191_v13 = vld [vmem:[#allocation2 + $0xa8] sm:$0x1] }
  0xae   :  { %v1168_v10 = vadd.f32 %v1048_v18, %v808_v6  ;;  %v1446_v15 = vadd.f32 %v1382_v11, %v1254_v24  ;;  %v641_v8 = vmax.f32 %v1890_v25, %v416_v20  ;;  %v642_v14 = vmax.f32 %v1892_v44, %v417_v36 }
  0xaf   :  { %v1986_v60 = vadd.f32 %v1056_v5, %v816_v27  ;;  %v1447_v43 = vadd.f32 %v1383_v28, %v1255_v3  ;;  %v656_v49 = vmax.f32 %v416_v20, %v1982_v2  ;;  %v657_v38 = vmax.f32 %v417_v36, %v1984_v26  ;;  %v174_v3 = vld [vmem:[#allocation2 + $0x97] sm:$0x1] }
  0xb0   :  { %v1256_v41 = vmul.f32 0.5, %v1168_v10  ;;  %1510 = vst [vmem:[#allocation5 + $0x1e] sm:$0x1] %v1446_v15  ;;  %v809_v51 = vmul.f32 0.5, %v641_v8  ;;  %v929_v39 = vadd.f32 %v642_v14, %v640_v55  ;;  %v418_v46 = vmax.f32 %v171_v29, %v172_v30  ;;  %v190_v29 = vld [vmem:[#allocation2 + $0xa7] sm:$0x1] }
  0xb1   :  { %v1320_v47 = vadd.f32 %v1986_v60, %v1894_v22  ;;  %1511 = vst [vmem:[#allocation5 + $0x1f] sm:$0x1] %v1447_v43  ;;  %v817_v25 = vmul.f32 0.5, %v656_v49  ;;  %v937_v44 = vadd.f32 %v657_v38, %v655_v53  ;;  %v419_v24 = vmax.f32 %v172_v30, %v173_v34  ;;  %v176_v43 = vld [vmem:[#allocation2 + $0x99] sm:$0x1] }
  0xb2   :  { %v1994_v42 = vmax.f32 %v187_v9, %v188_v61  ;;  %v1049_v48 = vmul.f32 0.25, %v929_v39  ;;  %v1996_v33 = vmax.f32 %v188_v61, %v189_v21  ;;  %v643_v62 = vmax.f32 %v1902_v16, %v418_v46 }
  0xb3   :  { %v1384_v37 = vmul.f32 0.25, %v1320_v47  ;;  %v1057_v45 = vmul.f32 0.25, %v937_v44  ;;  %v644_v22 = vmax.f32 %v1904_v12, %v419_v24  ;;  %v420_v6 = vmax.f32 %v173_v34, %v174_v3 }
  0xb4   :  { %v658_v55 = vmax.f32 %v418_v46, %v1994_v42  ;;  %v1169_v18 = vadd.f32 %v1049_v48, %v809_v51  ;;  %v659_v9 = vmax.f32 %v419_v24, %v1996_v33  ;;  %v810_v20 = vmul.f32 0.5, %v643_v62  ;;  %v192_v46 = vld [vmem:[#allocation2 + $0xa9] sm:$0x1] }
  0xb5   :  { %v1448_v53 = vadd.f32 %v1384_v37, %v1256_v41  ;;  %v2002_v11 = vadd.f32 %v1057_v45, %v817_v25  ;;  %v930_v5 = vadd.f32 %v644_v22, %v642_v14  ;;  %v421_v16 = vmax.f32 %v174_v3, %v175_v23  ;;  %v177_v41 = vld [vmem:[#allocation2 + $0x9a] sm:$0x1]  ;;  %v193_v25 = vld [vmem:[#allocation2 + $0xaa] sm:$0x1] }
  0xb6   :  { %v818_v27 = vmul.f32 0.5, %v658_v55  ;;  %v1257_v36 = vmul.f32 0.5, %v1169_v18  ;;  %v938_v28 = vadd.f32 %v659_v9, %v657_v38  ;;  %v2004_v10 = vmax.f32 %v189_v21, %v190_v29  ;;  %v178_v55 = vld [vmem:[#allocation2 + $0x9b] sm:$0x1] }
  0xb7   :  { %1512 = vst [vmem:[#allocation5 + $0x20] sm:$0x1] %v1448_v53  ;;  %v2006_v12 = vmax.f32 %v190_v29, %v191_v13  ;;  %v1321_v15 = vadd.f32 %v2002_v11, %v1910_v4  ;;  %v1050_v8 = vmul.f32 0.25, %v930_v5  ;;  %v645_v30 = vmax.f32 %v1912_v32, %v420_v6  ;;  %v179_v29 = vld [vmem:[#allocation2 + $0x9c] sm:$0x1] }
  0xb8   :  { %v646_v34 = vmax.f32 %v1914_v0, %v421_v16  ;;  %v1058_v49 = vmul.f32 0.25, %v938_v28  ;;  %v660_v14 = vmax.f32 %v420_v6, %v2004_v10  ;;  %v422_v38 = vmax.f32 %v175_v23, %v176_v43  ;;  %v194_v5 = vld [vmem:[#allocation2 + $0xab] sm:$0x1] }
  0xb9   :  { %v661_v61 = vmax.f32 %v421_v16, %v2006_v12  ;;  %v1385_v21 = vmul.f32 0.25, %v1321_v15  ;;  %v1170_v47 = vadd.f32 %v1050_v8, %v810_v20  ;;  %v811_v51 = vmul.f32 0.5, %v645_v30  ;;  %v195_v16 = vld [vmem:[#allocation2 + $0xac] sm:$0x1] }
  0xba   :  { %v931_v39 = vadd.f32 %v646_v34, %v644_v22  ;;  %v2014_v4 = vadd.f32 %v1058_v49, %v818_v27  ;;  %v819_v44 = vmul.f32 0.5, %v660_v14  ;;  %v423_v24 = vmax.f32 %v176_v43, %v177_v41 }
  0xbb   :  { %v939_v32 = vadd.f32 %v661_v61, %v659_v9  ;;  %v1449_v0 = vadd.f32 %v1385_v21, %v1257_v36  ;;  %v1258_v37 = vmul.f32 0.5, %v1170_v47  ;;  %v2016_v62 = vmax.f32 %v191_v13, %v192_v46  ;;  %v180_v21 = vld [vmem:[#allocation2 + $0x9d] sm:$0x1]  ;;  %v181_v47 = vld [vmem:[#allocation2 + $0x9e] sm:$0x1] }
  0xbc   :  { %v1051_v48 = vmul.f32 0.25, %v931_v39  ;;  %v1322_v3 = vadd.f32 %v2014_v4, %v1922_v57  ;;  %v2020_v45 = vmax.f32 %v192_v46, %v193_v25  ;;  %v647_v22 = vmax.f32 %v1924_v35, %v422_v38 }
  0xbd   :  { %v1059_v23 = vmul.f32 0.25, %v939_v32  ;;  %1513 = vst [vmem:[#allocation5 + $0x21] sm:$0x1] %v1449_v0  ;;  %v648_v53 = vmax.f32 %v1928_v31, %v423_v24  ;;  %v662_v18 = vmax.f32 %v422_v38, %v2016_v62  ;;  %v424_v9 = vmax.f32 %v177_v41, %v178_v55  ;;  %v196_v32 = vld [vmem:[#allocation2 + $0xad] sm:$0x1] }
  0xbe   :  { %v1171_v6 = vadd.f32 %v1051_v48, %v811_v51  ;;  %v1386_v20 = vmul.f32 0.25, %v1322_v3  ;;  %v663_v27 = vmax.f32 %v423_v24, %v2020_v45  ;;  %v812_v57 = vmul.f32 0.5, %v647_v22  ;;  %v197_v24 = vld [vmem:[#allocation2 + $0xae] sm:$0x1]  ;;  %v182_v48 = vld [vmem:[#allocation2 + $0x9f] sm:$0x1] }
  0xbf   :  { %v2025_v13 = vadd.f32 %v1059_v23, %v819_v44  ;;  %v820_v28 = vmul.f32 0.5, %v662_v18  ;;  %v932_v35 = vadd.f32 %v648_v53, %v646_v34  ;;  %v425_v15 = vmax.f32 %v178_v55, %v179_v29 }
  0xc0   :  { %v1259_v36 = vmul.f32 0.5, %v1171_v6  ;;  %v1450_v8 = vadd.f32 %v1386_v20, %v1258_v37  ;;  %v940_v31 = vadd.f32 %v663_v27, %v661_v61  ;;  %v2030_v43 = vmax.f32 %v193_v25, %v194_v5 }
  0xc1   :  { %v1323_v30 = vadd.f32 %v2025_v13, %v1933_v56  ;;  %v1052_v41 = vmul.f32 0.25, %v932_v35  ;;  %v2032_v49 = vmax.f32 %v194_v5, %v195_v16  ;;  %v649_v14 = vmax.f32 %v1938_v7, %v424_v9 }
  0xc2   :  { %v650_v38 = vmax.f32 %v1940_v17, %v425_v15  ;;  %1514 = vst [vmem:[#allocation5 + $0x22] sm:$0x1] %v1450_v8  ;;  %v1060_v34 = vmul.f32 0.25, %v940_v31  ;;  %v664_v39 = vmax.f32 %v424_v9, %v2030_v43  ;;  %v426_v46 = vmax.f32 %v179_v29, %v180_v21  ;;  %v198_v9 = vld [vmem:[#allocation2 + $0xaf] sm:$0x1] }
  0xc3   :  { %v1387_v51 = vmul.f32 0.25, %v1323_v30  ;;  %v1172_v44 = vadd.f32 %v1052_v41, %v812_v57  ;;  %v665_v56 = vmax.f32 %v425_v15, %v2032_v49  ;;  %v813_v61 = vmul.f32 0.5, %v649_v14  ;;  %v200_v31 = vld [vmem:[#allocation2 + $0xb1] sm:$0x1] }
  0xc4   :  { %v933_v25 = vadd.f32 %v650_v38, %v648_v53  ;;  %v2038_v37 = vadd.f32 %v1060_v34, %v820_v28  ;;  %v821_v7 = vmul.f32 0.5, %v664_v39  ;;  %v427_v17 = vmax.f32 %v180_v21, %v181_v47 }
  0xc5   :  { %v1451_v0 = vadd.f32 %v1387_v51, %v1259_v36  ;;  %v1260_v3 = vmul.f32 0.5, %v1172_v44  ;;  %v941_v23 = vadd.f32 %v665_v56, %v663_v27  ;;  %v2040_v55 = vmax.f32 %v195_v16, %v196_v32  ;;  %v201_v51 = vld [vmem:[#allocation2 + $0xb2] sm:$0x1]  ;;  %v216_v44 = vld [vmem:[#allocation2 + $0xc1] sm:$0x1] }
  0xc6   :  { %v1053_v22 = vmul.f32 0.25, %v933_v25  ;;  %v1324_v29 = vadd.f32 %v2038_v37, %v1946_v58  ;;  %v2044_v6 = vmax.f32 %v196_v32, %v197_v24  ;;  %v651_v53 = vmax.f32 %v1948_v54, %v426_v46  ;;  %v199_v54 = vld [vmem:[#allocation2 + $0xb0] sm:$0x1] }
  0xc7   :  { %1515 = vst [vmem:[#allocation5 + $0x23] sm:$0x1] %v1451_v0  ;;  %v652_v18 = vmax.f32 %v1952_v52, %v427_v17  ;;  %v1061_v20 = vmul.f32 0.25, %v941_v23  ;;  %v666_v5 = vmax.f32 %v426_v46, %v2040_v55  ;;  %v428_v36 = vmax.f32 %v181_v47, %v182_v48  ;;  %v215_v47 = vld [vmem:[#allocation2 + $0xc0] sm:$0x1] }
  0xc8   :  { %v1173_v57 = vadd.f32 %v1053_v22, %v813_v61  ;;  %v1388_v27 = vmul.f32 0.25, %v1324_v29  ;;  %v667_v16 = vmax.f32 %v427_v17, %v2044_v6  ;;  %v814_v28 = vmul.f32 0.5, %v651_v53  ;;  %v217_v61 = vld [vmem:[#allocation2 + $0xc2] sm:$0x1] }
  0xc9   :  { %v934_v35 = vadd.f32 %v652_v18, %v650_v38  ;;  %v2050_v15 = vadd.f32 %v1061_v20, %v821_v7  ;;  %v822_v8 = vmul.f32 0.5, %v666_v5  ;;  %v2052_v30 = vmax.f32 %v197_v24, %v198_v9  ;;  %v202_v9 = vld [vmem:[#allocation2 + $0xb3] sm:$0x1]  ;;  %v203_v20 = vld [vmem:[#allocation2 + $0xb4] sm:$0x1] }
  0xca   :  { %v1261_v58 = vmul.f32 0.5, %v1173_v57  ;;  %v1452_v52 = vadd.f32 %v1388_v27, %v1260_v3  ;;  %v942_v41 = vadd.f32 %v667_v16, %v665_v56  ;;  %v653_v21 = vmax.f32 %v1960_v19, %v428_v36 }
  0xcb   :  { %v1054_v14 = vmul.f32 0.25, %v934_v35  ;;  %v1325_v34 = vadd.f32 %v2050_v15, %v1958_v50  ;;  %v668_v38 = vmax.f32 %v428_v36, %v2052_v30  ;;  %v1055_v39 = vmul.f32 0.25, %v652_v18 }
  0xcc   :  { %v1063_v46 = vmul.f32 0.25, %v667_v16  ;;  %1516 = vst [vmem:[#allocation5 + $0x24] sm:$0x1] %v1452_v52  ;;  %v1062_v25 = vmul.f32 0.25, %v942_v41  ;;  %v815_v24 = vmul.f32 0.5, %v653_v21  ;;  %v444_v0 = vmax.f32 %v199_v54, %v200_v31 }
  0xcd   :  { %v1174_v32 = vadd.f32 %v1054_v14, %v814_v28  ;;  %v1389_v56 = vmul.f32 0.25, %v1325_v34  ;;  %v823_v7 = vmul.f32 0.5, %v668_v38  ;;  %v445_v17 = vmax.f32 %v200_v31, %v201_v51  ;;  %v218_v16 = vld [vmem:[#allocation2 + $0xc3] sm:$0x1]  ;;  %v219_v28 = vld [vmem:[#allocation2 + $0xc4] sm:$0x1] }
  0xce   :  { %v2058_v19 = vmax.f32 %v215_v47, %v216_v44  ;;  %v2060_v48 = vadd.f32 %v1062_v25, %v822_v8  ;;  %v1175_v50 = vadd.f32 %v1055_v39, %v815_v24  ;;  %v2062_v23 = vmax.f32 %v216_v44, %v217_v61  ;;  %v204_v39 = vld [vmem:[#allocation2 + $0xb5] sm:$0x1]  ;;  %v220_v24 = vld [vmem:[#allocation2 + $0xc5] sm:$0x1] }
  0xcf   :  { %v1262_v3 = vmul.f32 0.5, %v1174_v32  ;;  %v1453_v22 = vadd.f32 %v1389_v56, %v1261_v58  ;;  %v2064_v29 = vadd.f32 %v1063_v46, %v823_v7  ;;  %v669_v53 = vmax.f32 %v1966_v59, %v444_v0  ;;  %v205_v46 = vld [vmem:[#allocation2 + $0xb6] sm:$0x1] }
  0xd0   :  { %v670_v18 = vmax.f32 %v1970_v63, %v445_v17  ;;  %v1326_v57 = vadd.f32 %v2060_v48, %v1968_v1  ;;  %v1263_v5 = vmul.f32 0.5, %v1175_v50  ;;  %v684_v36 = vmax.f32 %v444_v0, %v2058_v19 }
  0xd1   :  { %v685_v27 = vmax.f32 %v445_v17, %v2062_v23  ;;  %1517 = vst [vmem:[#allocation5 + $0x25] sm:$0x1] %v1453_v22  ;;  %v1327_v35 = vadd.f32 %v2064_v29, %v1972_v40  ;;  %v824_v58 = vmul.f32 0.5, %v669_v53  ;;  %v446_v8 = vmax.f32 %v201_v51, %v202_v9 }
  0xd2   :  { %v1064_v59 = vmul.f32 0.25, %v670_v18  ;;  %v1390_v63 = vmul.f32 0.25, %v1326_v57  ;;  %v832_v54 = vmul.f32 0.5, %v684_v36  ;;  %v447_v52 = vmax.f32 %v202_v9, %v203_v20  ;;  %v207_v36 = vld [vmem:[#allocation2 + $0xb8] sm:$0x1] }
  0xd3   :  { %v1072_v31 = vmul.f32 0.25, %v685_v27  ;;  %v1391_v41 = vmul.f32 0.25, %v1327_v35  ;;  %v2074_v14 = vmax.f32 %v217_v61, %v218_v16  ;;  %v2076_v21 = vmax.f32 %v218_v16, %v219_v28  ;;  %v221_v61 = vld [vmem:[#allocation2 + $0xc6] sm:$0x1]  ;;  %v223_v35 = vld [vmem:[#allocation2 + $0xc8] sm:$0x1] }
  0xd4   :  { %v1184_v1 = vadd.f32 %v1064_v59, %v824_v58  ;;  %v1454_v47 = vadd.f32 %v1390_v63, %v1262_v3  ;;  %v671_v38 = vmax.f32 %v1982_v2, %v446_v8  ;;  %v672_v40 = vmax.f32 %v1984_v26, %v447_v52 }
  0xd5   :  { %v2078_v34 = vadd.f32 %v1072_v31, %v832_v54  ;;  %v1455_v51 = vadd.f32 %v1391_v41, %v1263_v5  ;;  %v686_v25 = vmax.f32 %v446_v8, %v2074_v14  ;;  %v687_v32 = vmax.f32 %v447_v52, %v2076_v21  ;;  %v206_v5 = vld [vmem:[#allocation2 + $0xb7] sm:$0x1] }
  0xd6   :  { %v1264_v44 = vmul.f32 0.5, %v1184_v1  ;;  %1518 = vst [vmem:[#allocation5 + $0x26] sm:$0x1] %v1454_v47  ;;  %v825_v56 = vmul.f32 0.5, %v671_v38  ;;  %v945_v7 = vadd.f32 %v672_v40, %v670_v18  ;;  %v448_v17 = vmax.f32 %v203_v20, %v204_v39  ;;  %v222_v20 = vld [vmem:[#allocation2 + $0xc7] sm:$0x1] }
  0xd7   :  { %v1328_v0 = vadd.f32 %v2078_v34, %v1986_v60  ;;  %1519 = vst [vmem:[#allocation5 + $0x27] sm:$0x1] %v1455_v51  ;;  %v833_v2 = vmul.f32 0.5, %v686_v25  ;;  %v953_v26 = vadd.f32 %v687_v32, %v685_v27  ;;  %v449_v3 = vmax.f32 %v204_v39, %v205_v46  ;;  %v208_v51 = vld [vmem:[#allocation2 + $0xb9] sm:$0x1] }
  0xd8   :  { %v2086_v50 = vmax.f32 %v219_v28, %v220_v24  ;;  %v1065_v53 = vmul.f32 0.25, %v945_v7  ;;  %v2088_v9 = vmax.f32 %v220_v24, %v221_v61  ;;  %v673_v57 = vmax.f32 %v1994_v42, %v448_v17 }
  0xd9   :  { %v1392_v22 = vmul.f32 0.25, %v1328_v0  ;;  %v1073_v16 = vmul.f32 0.25, %v953_v26  ;;  %v674_v60 = vmax.f32 %v1996_v33, %v449_v3  ;;  %v450_v58 = vmax.f32 %v205_v46, %v206_v5 }
  0xda   :  { %v688_v18 = vmax.f32 %v448_v17, %v2086_v50  ;;  %v1185_v59 = vadd.f32 %v1065_v53, %v825_v56  ;;  %v689_v28 = vmax.f32 %v449_v3, %v2088_v9  ;;  %v826_v8 = vmul.f32 0.5, %v673_v57  ;;  %v224_v17 = vld [vmem:[#allocation2 + $0xc9] sm:$0x1] }
  0xdb   :  { %v1456_v27 = vadd.f32 %v1392_v22, %v1264_v44  ;;  %v2094_v63 = vadd.f32 %v1073_v16, %v833_v2  ;;  %v946_v31 = vadd.f32 %v674_v60, %v672_v40  ;;  %v451_v42 = vmax.f32 %v206_v5, %v207_v36  ;;  %v209_v44 = vld [vmem:[#allocation2 + $0xba] sm:$0x1]  ;;  %v225_v2 = vld [vmem:[#allocation2 + $0xca] sm:$0x1] }
  0xdc   :  { %v834_v54 = vmul.f32 0.5, %v688_v18  ;;  %v1265_v52 = vmul.f32 0.5, %v1185_v59  ;;  %v954_v41 = vadd.f32 %v689_v28, %v687_v32  ;;  %v2096_v1 = vmax.f32 %v221_v61, %v222_v20  ;;  %v210_v18 = vld [vmem:[#allocation2 + $0xbb] sm:$0x1] }
  0xdd   :  { %1520 = vst [vmem:[#allocation5 + $0x28] sm:$0x1] %v1456_v27  ;;  %v2098_v33 = vmax.f32 %v222_v20, %v223_v35  ;;  %v1329_v47 = vadd.f32 %v2094_v63, %v2002_v11  ;;  %v1066_v38 = vmul.f32 0.25, %v946_v31  ;;  %v675_v39 = vmax.f32 %v2004_v10, %v450_v58  ;;  %v211_v20 = vld [vmem:[#allocation2 + $0xbc] sm:$0x1] }
  0xde   :  { %v676_v46 = vmax.f32 %v2006_v12, %v451_v42  ;;  %v1074_v25 = vmul.f32 0.25, %v954_v41  ;;  %v690_v40 = vmax.f32 %v450_v58, %v2096_v1  ;;  %v452_v32 = vmax.f32 %v207_v36, %v208_v51  ;;  %v226_v31 = vld [vmem:[#allocation2 + $0xcb] sm:$0x1] }
  0xdf   :  { %v691_v24 = vmax.f32 %v451_v42, %v2098_v33  ;;  %v1393_v61 = vmul.f32 0.25, %v1329_v47  ;;  %v1186_v0 = vadd.f32 %v1066_v38, %v826_v8  ;;  %v827_v56 = vmul.f32 0.5, %v675_v39  ;;  %v227_v42 = vld [vmem:[#allocation2 + $0xcc] sm:$0x1] }
  0xe0   :  { %v947_v7 = vadd.f32 %v676_v46, %v674_v60  ;;  %v2106_v11 = vadd.f32 %v1074_v25, %v834_v54  ;;  %v835_v26 = vmul.f32 0.5, %v690_v40  ;;  %v453_v3 = vmax.f32 %v208_v51, %v209_v44 }
  0xe1   :  { %v955_v10 = vadd.f32 %v691_v24, %v689_v28  ;;  %v1457_v12 = vadd.f32 %v1393_v61, %v1265_v52  ;;  %v1266_v22 = vmul.f32 0.5, %v1186_v0  ;;  %v2108_v57 = vmax.f32 %v223_v35, %v224_v17  ;;  %v212_v61 = vld [vmem:[#allocation2 + $0xbd] sm:$0x1]  ;;  %v213_v0 = vld [vmem:[#allocation2 + $0xbe] sm:$0x1] }
  0xe2   :  { %v1067_v53 = vmul.f32 0.25, %v947_v7  ;;  %v1330_v5 = vadd.f32 %v2106_v11, %v2014_v4  ;;  %v2112_v16 = vmax.f32 %v224_v17, %v225_v2  ;;  %v677_v60 = vmax.f32 %v2016_v62, %v452_v32 }
  0xe3   :  { %v1075_v36 = vmul.f32 0.25, %v955_v10  ;;  %1521 = vst [vmem:[#allocation5 + $0x29] sm:$0x1] %v1457_v12  ;;  %v678_v27 = vmax.f32 %v2020_v45, %v453_v3  ;;  %v692_v59 = vmax.f32 %v452_v32, %v2108_v57  ;;  %v454_v28 = vmax.f32 %v209_v44, %v210_v18  ;;  %v228_v10 = vld [vmem:[#allocation2 + $0xcd] sm:$0x1] }
  0xe4   :  { %v1187_v58 = vadd.f32 %v1067_v53, %v827_v56  ;;  %v1394_v8 = vmul.f32 0.25, %v1330_v5  ;;  %v693_v54 = vmax.f32 %v453_v3, %v2112_v16  ;;  %v828_v4 = vmul.f32 0.5, %v677_v60  ;;  %v229_v3 = vld [vmem:[#allocation2 + $0xce] sm:$0x1]  ;;  %v214_v53 = vld [vmem:[#allocation2 + $0xbf] sm:$0x1] }
  0xe5   :  { %v2117_v35 = vadd.f32 %v1075_v36, %v835_v26  ;;  %v836_v41 = vmul.f32 0.5, %v692_v59  ;;  %v948_v62 = vadd.f32 %v678_v27, %v676_v46  ;;  %v455_v47 = vmax.f32 %v210_v18, %v211_v20 }
  0xe6   :  { %v1267_v52 = vmul.f32 0.5, %v1187_v58  ;;  %v1458_v38 = vadd.f32 %v1394_v8, %v1266_v22  ;;  %v956_v45 = vadd.f32 %v693_v54, %v691_v24  ;;  %v2122_v51 = vmax.f32 %v225_v2, %v226_v31 }
  0xe7   :  { %v1331_v39 = vadd.f32 %v2117_v35, %v2025_v13  ;;  %v1068_v44 = vmul.f32 0.25, %v948_v62  ;;  %v2124_v25 = vmax.f32 %v226_v31, %v227_v42  ;;  %v679_v40 = vmax.f32 %v2030_v43, %v454_v28 }
  0xe8   :  { %v680_v32 = vmax.f32 %v2032_v49, %v455_v47  ;;  %1522 = vst [vmem:[#allocation5 + $0x2a] sm:$0x1] %v1458_v38  ;;  %v1076_v46 = vmul.f32 0.25, %v956_v45  ;;  %v694_v7 = vmax.f32 %v454_v28, %v2122_v51  ;;  %v456_v17 = vmax.f32 %v211_v20, %v212_v61  ;;  %v230_v28 = vld [vmem:[#allocation2 + $0xcf] sm:$0x1] }
  0xe9   :  { %v1395_v56 = vmul.f32 0.25, %v1331_v39  ;;  %v1188_v26 = vadd.f32 %v1068_v44, %v828_v4  ;;  %v695_v13 = vmax.f32 %v455_v47, %v2124_v25  ;;  %v829_v24 = vmul.f32 0.5, %v679_v40  ;;  %v232_v45 = vld [vmem:[#allocation2 + $0xd1] sm:$0x1] }
  0xea   :  { %v949_v2 = vadd.f32 %v680_v32, %v678_v27  ;;  %v2130_v22 = vadd.f32 %v1076_v46, %v836_v41  ;;  %v837_v43 = vmul.f32 0.5, %v694_v7  ;;  %v457_v49 = vmax.f32 %v212_v61, %v213_v0 }
  0xeb   :  { %v1459_v12 = vadd.f32 %v1395_v56, %v1267_v52  ;;  %v1268_v5 = vmul.f32 0.5, %v1188_v26  ;;  %v957_v36 = vadd.f32 %v695_v13, %v693_v54  ;;  %v2132_v18 = vmax.f32 %v227_v42, %v228_v10  ;;  %v233_v56 = vld [vmem:[#allocation2 + $0xd2] sm:$0x1]  ;;  %v248_v26 = vld [vmem:[#allocation2 + $0xe1] sm:$0x1] }
  0xec   :  { %v1069_v60 = vmul.f32 0.25, %v949_v2  ;;  %v1332_v20 = vadd.f32 %v2130_v22, %v2038_v37  ;;  %v2136_v58 = vmax.f32 %v228_v10, %v229_v3  ;;  %v681_v27 = vmax.f32 %v2040_v55, %v456_v17  ;;  %v231_v55 = vld [vmem:[#allocation2 + $0xd0] sm:$0x1] }
  0xed   :  { %1523 = vst [vmem:[#allocation5 + $0x2b] sm:$0x1] %v1459_v12  ;;  %v682_v59 = vmax.f32 %v2044_v6, %v457_v49  ;;  %v1077_v8 = vmul.f32 0.25, %v957_v36  ;;  %v696_v31 = vmax.f32 %v456_v17, %v2132_v18  ;;  %v458_v52 = vmax.f32 %v213_v0, %v214_v53  ;;  %v247_v0 = vld [vmem:[#allocation2 + $0xe0] sm:$0x1] }
  0xee   :  { %v1189_v4 = vadd.f32 %v1069_v60, %v829_v24  ;;  %v1396_v54 = vmul.f32 0.25, %v1332_v20  ;;  %v697_v42 = vmax.f32 %v457_v49, %v2136_v58  ;;  %v830_v41 = vmul.f32 0.5, %v681_v27  ;;  %v249_v24 = vld [vmem:[#allocation2 + $0xe2] sm:$0x1] }
  0xef   :  { %v950_v62 = vadd.f32 %v682_v59, %v680_v32  ;;  %v2142_v47 = vadd.f32 %v1077_v8, %v837_v43  ;;  %v838_v38 = vmul.f32 0.5, %v696_v31  ;;  %v2144_v39 = vmax.f32 %v229_v3, %v230_v28  ;;  %v234_v28 = vld [vmem:[#allocation2 + $0xd3] sm:$0x1]  ;;  %v235_v8 = vld [vmem:[#allocation2 + $0xd4] sm:$0x1] }
  0xf0   :  { %v1269_v37 = vmul.f32 0.5, %v1189_v4  ;;  %v1460_v6 = vadd.f32 %v1396_v54, %v1268_v5  ;;  %v958_v44 = vadd.f32 %v697_v42, %v695_v13  ;;  %v683_v61 = vmax.f32 %v2052_v30, %v458_v52 }
  0xf1   :  { %v1070_v40 = vmul.f32 0.25, %v950_v62  ;;  %v1333_v46 = vadd.f32 %v2142_v47, %v2050_v15  ;;  %v698_v32 = vmax.f32 %v458_v52, %v2144_v39  ;;  %v1071_v7 = vmul.f32 0.25, %v682_v59 }
  0xf2   :  { %v1079_v17 = vmul.f32 0.25, %v697_v42  ;;  %1524 = vst [vmem:[#allocation5 + $0x2c] sm:$0x1] %v1460_v6  ;;  %v1078_v2 = vmul.f32 0.25, %v958_v44  ;;  %v831_v3 = vmul.f32 0.5, %v683_v61  ;;  %v474_v12 = vmax.f32 %v231_v55, %v232_v45 }
  0xf3   :  { %v1190_v10 = vadd.f32 %v1070_v40, %v830_v41  ;;  %v1397_v13 = vmul.f32 0.25, %v1333_v46  ;;  %v839_v43 = vmul.f32 0.5, %v698_v32  ;;  %v475_v49 = vmax.f32 %v232_v45, %v233_v56  ;;  %v250_v42 = vld [vmem:[#allocation2 + $0xe3] sm:$0x1]  ;;  %v251_v41 = vld [vmem:[#allocation2 + $0xe4] sm:$0x1] }
  0xf4   :  { %v2150_v30 = vmax.f32 %v247_v0, %v248_v26  ;;  %v2152_v53 = vadd.f32 %v1078_v2, %v838_v38  ;;  %v1191_v15 = vadd.f32 %v1071_v7, %v831_v3  ;;  %v2154_v36 = vmax.f32 %v248_v26, %v249_v24  ;;  %v236_v7 = vld [vmem:[#allocation2 + $0xd5] sm:$0x1]  ;;  %v252_v3 = vld [vmem:[#allocation2 + $0xe5] sm:$0x1] }
  0xf5   :  { %v1270_v5 = vmul.f32 0.5, %v1190_v10  ;;  %v1461_v60 = vadd.f32 %v1397_v13, %v1269_v37  ;;  %v2156_v20 = vadd.f32 %v1079_v17, %v839_v43  ;;  %v699_v27 = vmax.f32 %v2058_v19, %v474_v12  ;;  %v237_v17 = vld [vmem:[#allocation2 + $0xd6] sm:$0x1] }
  0xf6   :  { %v700_v59 = vmax.f32 %v2062_v23, %v475_v49  ;;  %v1334_v4 = vadd.f32 %v2152_v53, %v2060_v48  ;;  %v1271_v31 = vmul.f32 0.5, %v1191_v15  ;;  %v714_v52 = vmax.f32 %v474_v12, %v2150_v30 }
  0xf7   :  { %v715_v54 = vmax.f32 %v475_v49, %v2154_v36  ;;  %1525 = vst [vmem:[#allocation5 + $0x2d] sm:$0x1] %v1461_v60  ;;  %v1335_v62 = vadd.f32 %v2156_v20, %v2064_v29  ;;  %v840_v37 = vmul.f32 0.5, %v699_v27  ;;  %v476_v38 = vmax.f32 %v233_v56, %v234_v28 }
  0xf8   :  { %v1080_v19 = vmul.f32 0.25, %v700_v59  ;;  %v1398_v23 = vmul.f32 0.25, %v1334_v4  ;;  %v848_v55 = vmul.f32 0.5, %v714_v52  ;;  %v477_v6 = vmax.f32 %v234_v28, %v235_v8  ;;  %v239_v52 = vld [vmem:[#allocation2 + $0xd8] sm:$0x1] }
  0xf9   :  { %v1088_v45 = vmul.f32 0.25, %v715_v54  ;;  %v1399_v44 = vmul.f32 0.25, %v1335_v62  ;;  %v2166_v40 = vmax.f32 %v249_v24, %v250_v42  ;;  %v2168_v61 = vmax.f32 %v250_v42, %v251_v41  ;;  %v253_v24 = vld [vmem:[#allocation2 + $0xe6] sm:$0x1]  ;;  %v255_v62 = vld [vmem:[#allocation2 + $0xe8] sm:$0x1] }
  0xfa   :  { %v1200_v48 = vadd.f32 %v1080_v19, %v840_v37  ;;  %v1462_v0 = vadd.f32 %v1398_v23, %v1270_v5  ;;  %v701_v32 = vmax.f32 %v2074_v14, %v476_v38  ;;  %v702_v29 = vmax.f32 %v2076_v21, %v477_v6 }
  0xfb   :  { %v2170_v46 = vadd.f32 %v1088_v45, %v848_v55  ;;  %v1463_v56 = vadd.f32 %v1399_v44, %v1271_v31  ;;  %v716_v2 = vmax.f32 %v476_v38, %v2166_v40  ;;  %v717_v10 = vmax.f32 %v477_v6, %v2168_v61  ;;  %v238_v31 = vld [vmem:[#allocation2 + $0xd7] sm:$0x1] }
  0xfc   :  { %v1272_v26 = vmul.f32 0.5, %v1200_v48  ;;  %1526 = vst [vmem:[#allocation5 + $0x2e] sm:$0x1] %v1462_v0  ;;  %v841_v13 = vmul.f32 0.5, %v701_v32  ;;  %v961_v43 = vadd.f32 %v702_v29, %v700_v59  ;;  %v478_v49 = vmax.f32 %v235_v8, %v236_v7  ;;  %v254_v8 = vld [vmem:[#allocation2 + $0xe7] sm:$0x1] }
  0xfd   :  { %v1336_v12 = vadd.f32 %v2170_v46, %v2078_v34  ;;  %1527 = vst [vmem:[#allocation5 + $0x2f] sm:$0x1] %v1463_v56  ;;  %v849_v14 = vmul.f32 0.5, %v716_v2  ;;  %v969_v21 = vadd.f32 %v717_v10, %v715_v54  ;;  %v479_v5 = vmax.f32 %v236_v7, %v237_v17  ;;  %v240_v56 = vld [vmem:[#allocation2 + $0xd9] sm:$0x1] }
  0xfe   :  { %v2178_v15 = vmax.f32 %v251_v41, %v252_v3  ;;  %v1081_v27 = vmul.f32 0.25, %v961_v43  ;;  %v2180_v28 = vmax.f32 %v252_v3, %v253_v24  ;;  %v703_v4 = vmax.f32 %v2086_v50, %v478_v49 }
  0xff   :  { %v1400_v60 = vmul.f32 0.25, %v1336_v12  ;;  %v1089_v42 = vmul.f32 0.25, %v969_v21  ;;  %v704_v34 = vmax.f32 %v2088_v9, %v479_v5  ;;  %v480_v37 = vmax.f32 %v237_v17, %v238_v31 }
 0x100   :  { %v718_v59 = vmax.f32 %v478_v49, %v2178_v15  ;;  %v1201_v19 = vadd.f32 %v1081_v27, %v841_v13  ;;  %v719_v41 = vmax.f32 %v479_v5, %v2180_v28  ;;  %v842_v38 = vmul.f32 0.5, %v703_v4  ;;  %v256_v49 = vld [vmem:[#allocation2 + $0xe9] sm:$0x1] }
 0x101   :  { %v1464_v54 = vadd.f32 %v1400_v60, %v1272_v26  ;;  %v2186_v23 = vadd.f32 %v1089_v42, %v849_v14  ;;  %v962_v45 = vadd.f32 %v704_v34, %v702_v29  ;;  %v481_v50 = vmax.f32 %v238_v31, %v239_v52  ;;  %v241_v26 = vld [vmem:[#allocation2 + $0xda] sm:$0x1]  ;;  %v257_v14 = vld [vmem:[#allocation2 + $0xea] sm:$0x1] }
 0x102   :  { %v850_v55 = vmul.f32 0.5, %v718_v59  ;;  %v1273_v6 = vmul.f32 0.5, %v1201_v19  ;;  %v970_v44 = vadd.f32 %v719_v41, %v717_v10  ;;  %v2188_v48 = vmax.f32 %v253_v24, %v254_v8  ;;  %v242_v59 = vld [vmem:[#allocation2 + $0xdb] sm:$0x1] }
 0x103   :  { %1528 = vst [vmem:[#allocation5 + $0x30] sm:$0x1] %v1464_v54  ;;  %v2190_v9 = vmax.f32 %v254_v8, %v255_v62  ;;  %v1337_v0 = vadd.f32 %v2186_v23, %v2094_v63  ;;  %v1082_v32 = vmul.f32 0.25, %v962_v45  ;;  %v705_v7 = vmax.f32 %v2096_v1, %v480_v37  ;;  %v243_v8 = vld [vmem:[#allocation2 + $0xdc] sm:$0x1] }
 0x104   :  { %v706_v17 = vmax.f32 %v2098_v33, %v481_v50  ;;  %v1090_v2 = vmul.f32 0.25, %v970_v44  ;;  %v720_v29 = vmax.f32 %v480_v37, %v2188_v48  ;;  %v482_v10 = vmax.f32 %v239_v52, %v240_v56  ;;  %v258_v45 = vld [vmem:[#allocation2 + $0xeb] sm:$0x1] }
 0x105   :  { %v721_v3 = vmax.f32 %v481_v50, %v2190_v9  ;;  %v1401_v24 = vmul.f32 0.25, %v1337_v0  ;;  %v1202_v12 = vadd.f32 %v1082_v32, %v842_v38  ;;  %v843_v13 = vmul.f32 0.5, %v705_v7  ;;  %v259_v50 = vld [vmem:[#allocation2 + $0xec] sm:$0x1] }
 0x106   :  { %v963_v43 = vadd.f32 %v706_v17, %v704_v34  ;;  %v2198_v63 = vadd.f32 %v1090_v2, %v850_v55  ;;  %v851_v21 = vmul.f32 0.5, %v720_v29  ;;  %v483_v5 = vmax.f32 %v240_v56, %v241_v26 }
 0x107   :  { %v971_v1 = vadd.f32 %v721_v3, %v719_v41  ;;  %v1465_v33 = vadd.f32 %v1401_v24, %v1273_v6  ;;  %v1274_v60 = vmul.f32 0.5, %v1202_v12  ;;  %v2200_v4 = vmax.f32 %v255_v62, %v256_v49  ;;  %v244_v24 = vld [vmem:[#allocation2 + $0xdd] sm:$0x1]  ;;  %v245_v12 = vld [vmem:[#allocation2 + $0xde] sm:$0x1] }
 0x108   :  { %v1083_v27 = vmul.f32 0.25, %v963_v43  ;;  %v1338_v31 = vadd.f32 %v2198_v63, %v2106_v11  ;;  %v2204_v42 = vmax.f32 %v256_v49, %v257_v14  ;;  %v707_v34 = vmax.f32 %v2108_v57, %v482_v10 }
 0x109   :  { %v1091_v52 = vmul.f32 0.25, %v971_v1  ;;  %1529 = vst [vmem:[#allocation5 + $0x31] sm:$0x1] %v1465_v33  ;;  %v708_v54 = vmax.f32 %v2112_v16, %v483_v5  ;;  %v722_v19 = vmax.f32 %v482_v10, %v2200_v4  ;;  %v484_v41 = vmax.f32 %v241_v26, %v242_v59  ;;  %v260_v1 = vld [vmem:[#allocation2 + $0xed] sm:$0x1] }
 0x10a   :  { %v1203_v37 = vadd.f32 %v1083_v27, %v843_v13  ;;  %v1402_v38 = vmul.f32 0.25, %v1338_v31  ;;  %v723_v55 = vmax.f32 %v483_v5, %v2204_v42  ;;  %v844_v11 = vmul.f32 0.5, %v707_v34  ;;  %v261_v5 = vld [vmem:[#allocation2 + $0xee] sm:$0x1]  ;;  %v246_v27 = vld [vmem:[#allocation2 + $0xdf] sm:$0x1] }
 0x10b   :  { %v2209_v62 = vadd.f32 %v1091_v52, %v851_v21  ;;  %v852_v44 = vmul.f32 0.5, %v722_v19  ;;  %v964_v57 = vadd.f32 %v708_v54, %v706_v17  ;;  %v485_v0 = vmax.f32 %v242_v59, %v243_v8 }
 0x10c   :  { %v1275_v6 = vmul.f32 0.5, %v1203_v37  ;;  %v1466_v32 = vadd.f32 %v1402_v38, %v1274_v60  ;;  %v972_v16 = vadd.f32 %v723_v55, %v721_v3  ;;  %v2214_v56 = vmax.f32 %v257_v14, %v258_v45 }
 0x10d   :  { %v1339_v7 = vadd.f32 %v2209_v62, %v2117_v35  ;;  %v1084_v26 = vmul.f32 0.25, %v964_v57  ;;  %v2216_v2 = vmax.f32 %v258_v45, %v259_v50  ;;  %v709_v29 = vmax.f32 %v2122_v51, %v484_v41 }
 0x10e   :  { %v710_v10 = vmax.f32 %v2124_v25, %v485_v0  ;;  %1530 = vst [vmem:[#allocation5 + $0x32] sm:$0x1] %v1466_v32  ;;  %v1092_v17 = vmul.f32 0.25, %v972_v16  ;;  %v724_v43 = vmax.f32 %v484_v41, %v2214_v56  ;;  %v486_v49 = vmax.f32 %v243_v8, %v244_v24  ;;  %v262_v41 = vld [vmem:[#allocation2 + $0xef] sm:$0x1] }
 0x10f   :  { %v1403_v13 = vmul.f32 0.25, %v1339_v7  ;;  %v1204_v21 = vadd.f32 %v1084_v26, %v844_v11  ;;  %v725_v35 = vmax.f32 %v485_v0, %v2216_v2  ;;  %v845_v3 = vmul.f32 0.5, %v709_v29 }
 0x110   :  { %v965_v14 = vadd.f32 %v710_v10, %v708_v54  ;;  %v2222_v60 = vadd.f32 %v1092_v17, %v852_v44  ;;  %v853_v51 = vmul.f32 0.5, %v724_v43  ;;  %v487_v25 = vmax.f32 %v244_v24, %v245_v12  ;;  %v264_v24 = vld [vmem:[#allocation2 + $0xf1] sm:$0x1] }
 0x111   :  { %v1467_v33 = vadd.f32 %v1403_v13, %v1275_v6  ;;  %v1276_v31 = vmul.f32 0.5, %v1204_v21  ;;  %v973_v52 = vadd.f32 %v725_v35, %v723_v55  ;;  %v2224_v59 = vmax.f32 %v259_v50, %v260_v1  ;;  %v265_v13 = vld [vmem:[#allocation2 + $0xf2] sm:$0x1] }
 0x112   :  { %v1085_v34 = vmul.f32 0.25, %v965_v14  ;;  %v1340_v8 = vadd.f32 %v2222_v60, %v2130_v22  ;;  %v2228_v37 = vmax.f32 %v260_v1, %v261_v5  ;;  %v711_v54 = vmax.f32 %v2132_v18, %v486_v49  ;;  %v263_v18 = vld [vmem:[#allocation2 + $0xf0] sm:$0x1] }
 0x113   :  { %1531 = vst [vmem:[#allocation5 + $0x33] sm:$0x1] %v1467_v33  ;;  %v712_v19 = vmax.f32 %v2136_v58, %v487_v25  ;;  %v1093_v38 = vmul.f32 0.25, %v973_v52  ;;  %v726_v45 = vmax.f32 %v486_v49, %v2224_v59  ;;  %v488_v6 = vmax.f32 %v245_v12, %v246_v27  ;;  %v266_v33 = vld [vmem:[#allocation2 + $0xf3] sm:$0x1] }
 0x114   :  { %v1205_v11 = vadd.f32 %v1085_v34, %v845_v3  ;;  %v1404_v55 = vmul.f32 0.25, %v1340_v8  ;;  %v727_v50 = vmax.f32 %v487_v25, %v2228_v37  ;;  %v846_v44 = vmul.f32 0.5, %v711_v54  ;;  %v268_v8 = vld [vmem:[#allocation2 + $0xf5] sm:$0x1]  ;;  %v269_v54 = vld [vmem:[#allocation2 + $0xf6] sm:$0x1] }
 0x115   :  { %v966_v57 = vadd.f32 %v712_v19, %v710_v10  ;;  %v2234_v0 = vadd.f32 %v1093_v38, %v853_v51  ;;  %v854_v32 = vmul.f32 0.5, %v726_v45  ;;  %v2236_v7 = vmax.f32 %v261_v5, %v262_v41  ;;  %v267_v51 = vld [vmem:[#allocation2 + $0xf4] sm:$0x1] }
 0x116   :  { %v1277_v22 = vmul.f32 0.5, %v1205_v11  ;;  %v1468_v16 = vadd.f32 %v1404_v55, %v1276_v31  ;;  %v974_v58 = vadd.f32 %v727_v50, %v725_v35  ;;  %v713_v29 = vmax.f32 %v2144_v39, %v488_v6 }
 0x117   :  { %v1086_v26 = vmul.f32 0.25, %v966_v57  ;;  %v1341_v12 = vadd.f32 %v2234_v0, %v2142_v47  ;;  %v728_v17 = vmax.f32 %v488_v6, %v2236_v7  ;;  %v1087_v10 = vmul.f32 0.25, %v712_v19 }
 0x118   :  { %v1095_v43 = vmul.f32 0.25, %v727_v50  ;;  %1532 = vst [vmem:[#allocation5 + $0x34] sm:$0x1] %v1468_v16  ;;  %v1094_v49 = vmul.f32 0.25, %v974_v58  ;;  %v847_v3 = vmul.f32 0.5, %v713_v29  ;;  %v504_v14 = vmax.f32 %v263_v18, %v264_v24 }
 0x119   :  { %v1206_v21 = vadd.f32 %v1086_v26, %v846_v44  ;;  %v1405_v1 = vmul.f32 0.25, %v1341_v12  ;;  %v855_v5 = vmul.f32 0.5, %v728_v17  ;;  %v505_v35 = vmax.f32 %v264_v24, %v265_v13 }
 0x11a   :  { %v2242_v39 = vadd.f32 %v1094_v49, %v854_v32  ;;  %v1207_v25 = vadd.f32 %v1087_v10, %v847_v3  ;;  %v729_v27 = vmax.f32 %v2150_v30, %v504_v14  ;;  %v506_v34 = vmax.f32 %v265_v13, %v266_v33  ;;  %v271_v32 = vld [vmem:[#allocation2 + $0xf8] sm:$0x1]  ;;  %v273_v10 = vld [vmem:[#allocation2 + $0xfa] sm:$0x1] }
 0x11b   :  { %v1469_v47 = vadd.f32 %v1405_v1, %v1277_v22  ;;  %v2245_v31 = vadd.f32 %v1095_v43, %v855_v5  ;;  %v730_v52 = vmax.f32 %v2154_v36, %v505_v35  ;;  %v1278_v19 = vmul.f32 0.5, %v1206_v21  ;;  %v270_v22 = vld [vmem:[#allocation2 + $0xf7] sm:$0x1]  ;;  %v275_v5 = vld [vmem:[#allocation2 + $0xfc] sm:$0x1] }
 0x11c   :  { %v1342_v41 = vadd.f32 %v2242_v39, %v2152_v53  ;;  %v856_v38 = vmul.f32 0.5, %v729_v27  ;;  %v507_v11 = vmax.f32 %v266_v33, %v267_v51  ;;  %v1279_v45 = vmul.f32 0.5, %v1207_v25 }
 0x11d   :  { %1533 = vst [vmem:[#allocation5 + $0x35] sm:$0x1] %v1469_v47  ;;  %v1343_v6 = vadd.f32 %v2245_v31, %v2156_v20  ;;  %v1096_v30 = vmul.f32 0.25, %v730_v52  ;;  %v731_v55 = vmax.f32 %v2166_v40, %v506_v34  ;;  %v508_v44 = vmax.f32 %v267_v51, %v268_v8 }
 0x11e   :  { %v1406_v50 = vmul.f32 0.25, %v1342_v41  ;;  %v732_v36 = vmax.f32 %v2168_v61, %v507_v11  ;;  %v509_v57 = vmax.f32 %v268_v8, %v269_v54  ;;  %v1408_v53 = vmul.f32 0.25, %v2170_v46  ;;  %v272_v61 = vld [vmem:[#allocation2 + $0xf9] sm:$0x1] }
 0x11f   :  { %v1407_v18 = vmul.f32 0.25, %v1343_v6  ;;  %v1216_v16 = vadd.f32 %v1096_v30, %v856_v38  ;;  %v857_v58 = vmul.f32 0.5, %v731_v55  ;;  %v733_v24 = vmax.f32 %v2178_v15, %v508_v44  ;;  %v278_v55 = vld [vmem:[#allocation2 + $0xff] sm:$0x1] }
 0x120   :  { %v1470_v26 = vadd.f32 %v1406_v50, %v1278_v19  ;;  %v977_v29 = vadd.f32 %v732_v36, %v730_v52  ;;  %v734_v20 = vmax.f32 %v2180_v28, %v509_v57  ;;  %v510_v12 = vmax.f32 %v269_v54, %v270_v22  ;;  %v274_v28 = vld [vmem:[#allocation2 + $0xfb] sm:$0x1]  ;;  %v277_v19 = vld [vmem:[#allocation2 + $0xfe] sm:$0x1] }
 0x121   :  { %v1471_v13 = vadd.f32 %v1407_v18, %v1279_v45  ;;  %v1280_v40 = vmul.f32 0.5, %v1216_v16  ;;  %v511_v17 = vmax.f32 %v270_v22, %v271_v32  ;;  %v1409_v49 = vmul.f32 0.25, %v2186_v23 }
 0x122   :  { %1534 = vst [vmem:[#allocation5 + $0x36] sm:$0x1] %v1470_v26  ;;  %v1097_v43 = vmul.f32 0.25, %v977_v29  ;;  %v858_v21 = vmul.f32 0.5, %v733_v24  ;;  %v978_v3 = vadd.f32 %v734_v20, %v732_v36  ;;  %v735_v14 = vmax.f32 %v2188_v48, %v510_v12 }
 0x123   :  { %1535 = vst [vmem:[#allocation5 + $0x37] sm:$0x1] %v1471_v13  ;;  %v1472_v46 = vadd.f32 %v1408_v53, %v1280_v40  ;;  %v736_v15 = vmax.f32 %v2190_v9, %v511_v17  ;;  %v512_v1 = vmax.f32 %v271_v32, %v272_v61  ;;  %v1410_v51 = vmul.f32 0.25, %v2198_v63  ;;  %v276_v9 = vld [vmem:[#allocation2 + $0xfd] sm:$0x1] }
 0x124   :  { %v1217_v35 = vadd.f32 %v1097_v43, %v857_v58  ;;  %v1098_v33 = vmul.f32 0.25, %v978_v3  ;;  %v513_v25 = vmax.f32 %v272_v61, %v273_v10  ;;  %v859_v27 = vmul.f32 0.5, %v735_v14 }
 0x125   :  { %1536 = vst [vmem:[#allocation5 + $0x38] sm:$0x1] %v1472_v46  ;;  %v979_v47 = vadd.f32 %v736_v15, %v734_v20  ;;  %v737_v23 = vmax.f32 %v2200_v4, %v512_v1  ;;  %v514_v52 = vmax.f32 %v273_v10, %v274_v28  ;;  %v515_v54 = vmax.f32 %v274_v28, %v275_v5 }
 0x126   :  { %v1281_v34 = vmul.f32 0.5, %v1217_v35  ;;  %v1218_v8 = vadd.f32 %v1098_v33, %v858_v21  ;;  %v738_v48 = vmax.f32 %v2204_v42, %v513_v25  ;;  %v1411_v4 = vmul.f32 0.25, %v2209_v62 }
 0x127   :  { %v1099_v41 = vmul.f32 0.25, %v979_v47  ;;  %v860_v38 = vmul.f32 0.5, %v737_v23  ;;  %v739_v11 = vmax.f32 %v2214_v56, %v514_v52  ;;  %v740_v30 = vmax.f32 %v2216_v2, %v515_v54 }
 0x128   :  { %v1473_v45 = vadd.f32 %v1409_v49, %v1281_v34  ;;  %v1282_v63 = vmul.f32 0.5, %v1218_v8  ;;  %v980_v6 = vadd.f32 %v738_v48, %v736_v15  ;;  %v516_v36 = vmax.f32 %v275_v5, %v276_v9 }
 0x129   :  { %v1219_v50 = vadd.f32 %v1099_v41, %v859_v27  ;;  %v517_v44 = vmax.f32 %v276_v9, %v277_v19  ;;  %v861_v22 = vmul.f32 0.5, %v739_v11  ;;  %v981_v32 = vadd.f32 %v740_v30, %v738_v48 }
 0x12a   :  { %1537 = vst [vmem:[#allocation5 + $0x39] sm:$0x1] %v1473_v45  ;;  %v1474_v42 = vadd.f32 %v1410_v51, %v1282_v63  ;;  %v1100_v57 = vmul.f32 0.25, %v980_v6  ;;  %v741_v16 = vmax.f32 %v2224_v59, %v516_v36  ;;  %v518_v53 = vmax.f32 %v277_v19, %v278_v55 }
 0x12b   :  { %v1283_v18 = vmul.f32 0.5, %v1219_v50  ;;  %v742_v56 = vmax.f32 %v2228_v37, %v517_v44  ;;  %v1412_v2 = vmul.f32 0.25, %v2222_v60  ;;  %v1101_v26 = vmul.f32 0.25, %v981_v32 }
 0x12c   :  { %1538 = vst [vmem:[#allocation5 + $0x3a] sm:$0x1] %v1474_v42  ;;  %v1220_v58 = vadd.f32 %v1100_v57, %v860_v38  ;;  %v862_v62 = vmul.f32 0.5, %v741_v16  ;;  %v743_v20 = vmax.f32 %v2236_v7, %v518_v53  ;;  %v1413_v12 = vmul.f32 0.25, %v2234_v0 }
 0x12d   :  { %v1475_v29 = vadd.f32 %v1411_v4, %v1283_v18  ;;  %v982_v24 = vadd.f32 %v742_v56, %v740_v30  ;;  %v1221_v40 = vadd.f32 %v1101_v26, %v861_v22  ;;  %v1103_v17 = vmul.f32 0.25, %v742_v56 }
 0x12e   :  { %v1284_v13 = vmul.f32 0.5, %v1220_v58  ;;  %v863_v61 = vmul.f32 0.5, %v743_v20  ;;  %v1414_v49 = vmul.f32 0.25, %v2242_v39  ;;  %v1415_v21 = vmul.f32 0.25, %v2245_v31 }
 0x12f   :  { %1539 = vst [vmem:[#allocation5 + $0x3b] sm:$0x1] %v1475_v29  ;;  %v1102_v59 = vmul.f32 0.25, %v982_v24  ;;  %v1285_v10 = vmul.f32 0.5, %v1221_v40 }
 0x130   :  { %v1476_v37 = vadd.f32 %v1412_v2, %v1284_v13  ;;  %v1223_v60 = vadd.f32 %v1103_v17, %v863_v61 }
 0x131   :  { %v1222_v43 = vadd.f32 %v1102_v59, %v862_v62  ;;  %v1477_v3 = vadd.f32 %v1413_v12, %v1285_v10 }
 0x132   :  { %1540 = vst [vmem:[#allocation5 + $0x3c] sm:$0x1] %v1476_v37  ;;  %v1287_v46 = vmul.f32 0.5, %v1223_v60 }
 0x133   :  { %v1286_v7 = vmul.f32 0.5, %v1222_v43  ;;  %1541 = vst [vmem:[#allocation5 + $0x3d] sm:$0x1] %v1477_v3 }
 0x134   :  { %v1479_v14 = vadd.f32 %v1415_v21, %v1287_v46 }
 0x135   :  { %v1478_v0 = vadd.f32 %v1414_v49, %v1286_v7 }
 0x136   :  { %1543 = vst [vmem:[#allocation5 + $0x3f] sm:$0x1] %v1479_v14 }
 0x137   :  { %1542 = vst [vmem:[#allocation5 + $0x3e] sm:$0x1] %v1478_v0 }
 0x138   :  { %1596 = shalt.err (!%p1593_p9)
}
 0x139   :  { %1555 = dma.vmem_to_hbm [thread:$0]  %s1550_s13, 1024, %s2280_s1, [#allocation4], %s1610_s9, %s1610_s9, %s1611_s10  }
 0x13a   :  { %1607 = dma.done.wait [#allocation4], 1024  }
 0x13b   :  { %1608 = vsyncadd [#allocation4], 4294966272 }
 0x13c   :  { %1559 = vsyncpa [#allocation3], 1 }
 0x13d   :  { %1560 = vsyncpa [#allocation4], 1 }

</bundles_post_ra>
